<compile_context>
chip_gen: v5e
topology: v5e:2x2
jax: 0.10.0
libtpu: 0.0.40
codegen_flags: <defaults>
</compile_context>

<pallas_src>
from functools import partial

import jax
import jax.numpy as jnp
from jax import lax
from jax.experimental import pallas as pl
from jax.experimental.pallas import tpu as pltpu


def _basic_block_kernel(x_ref, w1_ref, w2_ref, s1_ref, b1_ref, s2_ref, b2_ref,
                        out_ref, *, tile_h, img_h):
    """One (batch n, row-tile r) step.

    Shapes:
      x_ref  : (1, H, W, Cin)   full image, resident across the r axis (bf16)
      w1_ref : (3, 3*Cin, C)    conv1 weights fused along kx  [ky, kx*Cin+ci, co]
      w2_ref : (3, 3*C,  C)     conv2 weights fused along kx
      s*_ref : (1, C) f32       folded BN scale;  b*_ref: (1, C) f32 folded bias
      out_ref: (1, TH, W, C)    this tile's output rows
    """
    TH, H = tile_h, img_h
    _, _, W, Cin = x_ref.shape
    C = out_ref.shape[-1]
    cdt = x_ref.dtype                    # compute dtype for MXU operands (bf16)

    r = pl.program_id(1)
    R0 = pl.multiple_of(r * TH, TH)      # first output row of this tile

    # ---- gather the tile's input rows plus a 2-row halo on each side -------
    # core rows double as the identity residual.
    core = x_ref[:, pl.ds(R0, TH), :, :][0]                            # (TH, W, Cin)
    top = x_ref[:, pl.ds(jnp.maximum(R0 - 2, 0), 2), :, :][0]          # (2, W, Cin)
    bot = x_ref[:, pl.ds(jnp.minimum(R0 + TH, H - 2), 2), :, :][0]     # (2, W, Cin)
    slab = jnp.concatenate([top, core, bot], axis=0)                   # (TH+4, W, Cin)

    # zero the rows that fall outside the image (conv1's H zero-padding);
    # the clamped halo loads above may hold in-image data there.
    slab_rows = R0 - 2 + lax.broadcasted_iota(jnp.int32, (TH + 4, 1, 1), 0)
    slab = jnp.where((slab_rows >= 0) & (slab_rows < H), slab, 0)

    def kx_fuse(a):
        # a: (Rows, W, Ch) -> (Rows, W, 3*Ch); column w gathers cols w-1, w, w+1
        # with zero columns at the W boundary (the conv's W zero-padding).
        rows, width, ch = a.shape
        zc = jnp.zeros((rows, 1, ch), a.dtype)
        left = jnp.concatenate([zc, a[:, :width - 1, :]], axis=1)      # kx = 0
        right = jnp.concatenate([a[:, 1:, :], zc], axis=1)             # kx = 2
        return jnp.concatenate([left, a, right], axis=-1)              # (Rows, W, 3*Ch)

    def conv_rows(xk, w_ref, out_rows):
        # 3 MXU matmuls (K = 3*Ch), ky handled by leading-dim slices of xk.
        kdim = xk.shape[-1]
        cout = w_ref.shape[-1]
        acc = jnp.zeros((out_rows * W, cout), jnp.float32)
        for ky in range(3):
            patch = xk[ky:ky + out_rows].reshape(out_rows * W, kdim)
            acc = acc + jnp.dot(patch, w_ref[ky],
                                preferred_element_type=jnp.float32)
        return acc

    # ---- conv1 -> bn1 -> relu on TH+2 rows (1 halo row each side for conv2) -
    xk = kx_fuse(slab)                                                 # (TH+4, W, 3*Cin)
    acc1 = conv_rows(xk, w1_ref, TH + 2)                               # ((TH+2)*W, C) f32
    out1 = jnp.maximum(acc1 * s1_ref[0] + b1_ref[0], 0.0)
    out1 = out1.reshape(TH + 2, W, C)

    # conv2's H zero-padding: rows outside the image must be exactly zero.
    o1_rows = R0 - 1 + lax.broadcasted_iota(jnp.int32, (TH + 2, 1, 1), 0)
    out1 = jnp.where((o1_rows >= 0) & (o1_rows < H), out1, 0.0)
    out1 = out1.astype(cdt)                                            # bf16 for MXU

    # ---- conv2 -> bn2 -> + residual -> relu --------------------------------
    yk = kx_fuse(out1)                                                 # (TH+2, W, 3*C)
    acc2 = conv_rows(yk, w2_ref, TH)                                   # (TH*W, C) f32
    res = core.reshape(TH * W, Cin).astype(jnp.float32)
    out = jnp.maximum(acc2 * s2_ref[0] + b2_ref[0] + res, 0.0)
    out_ref[...] = out.reshape(1, TH, W, C).astype(out_ref.dtype)


def basic_block_pallas_nhwc(x_nhwc, w1, w2, bn1, bn2, eps=1e-5,
                            compute_dtype=jnp.bfloat16, tile_rows=8):
    """x_nhwc: (N, H, W, Cin); w1, w2: (Cout, Cin, 3, 3) PyTorch conv weights.
    bn1/bn2: dicts with gamma, beta, mean, var of shape (C,). Eval-mode BN."""
    N, H, W, Cin = x_nhwc.shape
    C = w1.shape[0]
    assert Cin == C, "identity residual requires inplanes == planes (stride=1)"
    assert w1.shape == (C, Cin, 3, 3) and w2.shape == (C, C, 3, 3)

    TH = tile_rows if (tile_rows >= 2 and H % tile_rows == 0) else H
    R = H // TH

    # ---- wrapper glue (plain JAX): dtype casts, weight/BN folding ----------
    x = x_nhwc.astype(compute_dtype)

    def fold_w(w_oihw):
        o, i = w_oihw.shape[0], w_oihw.shape[1]
        w = jnp.transpose(w_oihw, (2, 3, 1, 0))          # (ky, kx, ci, co)
        return w.reshape(3, 3 * i, o).astype(compute_dtype)

    w1f, w2f = fold_w(w1), fold_w(w2)

    def fold_bn(p):
        scale = p["gamma"].astype(jnp.float32) / jnp.sqrt(
            p["var"].astype(jnp.float32) + eps)
        bias = p["beta"].astype(jnp.float32) - p["mean"].astype(jnp.float32) * scale
        return scale.reshape(1, C), bias.reshape(1, C)

    s1, b1 = fold_bn(bn1)
    s2, b2 = fold_bn(bn2)

    kernel = partial(_basic_block_kernel, tile_h=TH, img_h=H)

    return pl.pallas_call(
        kernel,
        out_shape=jax.ShapeDtypeStruct((N, H, W, C), x_nhwc.dtype),
        grid_spec=pltpu.PrefetchScalarGridSpec(
            num_scalar_prefetch=0,
            grid=(N, R),
            in_specs=[
                # full image, resident across the row-tile axis (no per-r DMA)
                pl.BlockSpec((1, H, W, Cin), lambda n, r: (n, 0, 0, 0)),
                pl.BlockSpec((3, 3 * Cin, C), lambda n, r: (0, 0, 0)),
                pl.BlockSpec((3, 3 * C, C), lambda n, r: (0, 0, 0)),
                pl.BlockSpec((1, C), lambda n, r: (0, 0)),
                pl.BlockSpec((1, C), lambda n, r: (0, 0)),
                pl.BlockSpec((1, C), lambda n, r: (0, 0)),
                pl.BlockSpec((1, C), lambda n, r: (0, 0)),
            ],
            out_specs=pl.BlockSpec((1, TH, W, C), lambda n, r: (n, r, 0, 0)),
        ),
        compiler_params=pltpu.CompilerParams(
            dimension_semantics=("parallel", "parallel"),
            vmem_limit_bytes=32 * 1024 * 1024,
        ),
    )(x, w1f, w2f, s1, b1, s2, b2)


def basic_block_pallas(x_nchw, w1, w2, bn1, bn2, eps=1e-5,
                       compute_dtype=jnp.bfloat16, tile_rows=8):
    """PyTorch-layout (NCHW) boundary wrapper. When chaining blocks, prefer
    basic_block_pallas_nhwc so the layout transposes happen once per network."""
    out_nhwc = basic_block_pallas_nhwc(
        jnp.transpose(x_nchw, (0, 2, 3, 1)), w1, w2, bn1, bn2,
        eps=eps, compute_dtype=compute_dtype, tile_rows=tile_rows)
    return jnp.transpose(out_nhwc, (0, 3, 1, 2))


def _reference(x_nchw, w1, w2, bn1, bn2, eps=1e-5, compute_dtype=jnp.bfloat16):
    # Pure-JAX reference with matching numerics (bf16 conv operands, f32 acc).
    x = jnp.transpose(x_nchw, (0, 2, 3, 1)).astype(compute_dtype)

    def conv(a, w_oihw):
        w_hwio = jnp.transpose(w_oihw, (2, 3, 1, 0)).astype(compute_dtype)
        return lax.conv_general_dilated(
            a, w_hwio, (1, 1), ((1, 1), (1, 1)),
            dimension_numbers=("NHWC", "HWIO", "NHWC"),
            preferred_element_type=jnp.float32)

    def bn(a, p):
        scale = p["gamma"] / jnp.sqrt(p["var"] + eps)
        return a * scale + (p["beta"] - p["mean"] * scale)

    out = jnp.maximum(bn(conv(x, w1), bn1), 0.0)
    out = bn(conv(out.astype(compute_dtype), w2), bn2) + x.astype(jnp.float32)
    out = jnp.maximum(out, 0.0)
    return jnp.transpose(out, (0, 3, 1, 2)).astype(x_nchw.dtype)


if __name__ == "__main__":
    key = jax.random.PRNGKey(0)
    N, C, H, W = 2, 4, 16, 16                       # BasicBlock(inplanes=4, planes=4)

    ks = jax.random.split(key, 8)
    x = jax.random.normal(ks[0], (N, C, H, W), jnp.float32)

    # conv weights ~ N(0, sqrt(2/n)) as in the PyTorch init (n = 3*3*out_channels)
    std = (2.0 / (3 * 3 * C)) ** 0.5
    w1 = jax.random.normal(ks[1], (C, C, 3, 3), jnp.float32) * std
    w2 = jax.random.normal(ks[2], (C, C, 3, 3), jnp.float32) * std

    def make_bn(k):
        k1, k2, k3, k4 = jax.random.split(k, 4)
        return dict(
            gamma=jax.random.uniform(k1, (C,), jnp.float32, 0.5, 1.5),
            beta=0.1 * jax.random.normal(k2, (C,), jnp.float32),
            mean=0.1 * jax.random.normal(k3, (C,), jnp.float32),
            var=jax.random.uniform(k4, (C,), jnp.float32, 0.5, 1.5),
        )

    bn1 = make_bn(ks[3])
    bn2 = make_bn(ks[4])

    out = basic_block_pallas(x, w1, w2, bn1, bn2)
    out = jax.block_until_ready(out)

    ref = _reference(x, w1, w2, bn1, bn2)
    assert out.shape == (N, C, H, W)
    assert jnp.allclose(out, ref, atol=5e-3, rtol=5e-3), "mismatch vs JAX reference"
    print("KERNEL_OK")
</pallas_src>

<mosaic_0001>
module attributes {stable_mosaic.version = 11 : i64} {
  func.func @_basic_block_kernel(%arg0: i32, %arg1: i32, %arg2: memref<1x16x16x4xbf16, #tpu.memory_space<vmem>>, %arg3: memref<3x12x4xbf16, #tpu.memory_space<vmem>>, %arg4: memref<3x12x4xbf16, #tpu.memory_space<vmem>>, %arg5: memref<1x4xf32, #tpu.memory_space<vmem>>, %arg6: memref<1x4xf32, #tpu.memory_space<vmem>>, %arg7: memref<1x4xf32, #tpu.memory_space<vmem>>, %arg8: memref<1x4xf32, #tpu.memory_space<vmem>>, %arg9: memref<1x8x16x4xf32, #tpu.memory_space<vmem>>) attributes {dimension_semantics = [#tpu.dimension_semantics<parallel>, #tpu.dimension_semantics<parallel>], iteration_bounds = array<i64: 2, 2>, scalar_prefetch = 0 : i64, scratch_operands = 0 : i64, tpu.core_type = #tpu.core_type<tc>, window_params = [{transform_indices = @transform_0, window_bounds = array<i64: 1, 16, 16, 4>}, {pipeline_mode = #tpu.pipeline_mode<synchronous>, transform_indices = @transform_1, window_bounds = array<i64: 3, 12, 4>}, {pipeline_mode = #tpu.pipeline_mode<synchronous>, transform_indices = @transform_2, window_bounds = array<i64: 3, 12, 4>}, {pipeline_mode = #tpu.pipeline_mode<synchronous>, transform_indices = @transform_3, window_bounds = array<i64: 1, 4>}, {pipeline_mode = #tpu.pipeline_mode<synchronous>, transform_indices = @transform_4, window_bounds = array<i64: 1, 4>}, {pipeline_mode = #tpu.pipeline_mode<synchronous>, transform_indices = @transform_5, window_bounds = array<i64: 1, 4>}, {pipeline_mode = #tpu.pipeline_mode<synchronous>, transform_indices = @transform_6, window_bounds = array<i64: 1, 4>}, {transform_indices = @transform_7, window_bounds = array<i64: 1, 8, 16, 4>}]} {
    %c8_i32 = arith.constant 8 : i32
    %0 = arith.muli %arg1, %c8_i32 : i32
    %1 = tpu.assume_multiple %0, 8 : i32
    %c0 = arith.constant 0 : index
    %2 = arith.index_cast %1 : i32 to index
    %c0_0 = arith.constant 0 : index
    %c0_1 = arith.constant 0 : index
    %3 = vector.load %arg2[%c0, %2, %c0_0, %c0_1] : memref<1x16x16x4xbf16, #tpu.memory_space<vmem>>, vector<1x8x16x4xbf16>
    %4 = vector.shape_cast %3 : vector<1x8x16x4xbf16> to vector<8x16x4xbf16>
    %c2_i32 = arith.constant 2 : i32
    %5 = arith.subi %1, %c2_i32 : i32
    %c0_i32 = arith.constant 0 : i32
    %6 = arith.maxsi %5, %c0_i32 : i32
    %c0_2 = arith.constant 0 : index
    %7 = arith.index_cast %6 : i32 to index
    %c0_3 = arith.constant 0 : index
    %c0_4 = arith.constant 0 : index
    %8 = vector.load %arg2[%c0_2, %7, %c0_3, %c0_4] : memref<1x16x16x4xbf16, #tpu.memory_space<vmem>>, vector<1x2x16x4xbf16>
    %9 = vector.shape_cast %8 : vector<1x2x16x4xbf16> to vector<2x16x4xbf16>
    %c8_i32_5 = arith.constant 8 : i32
    %10 = arith.addi %1, %c8_i32_5 : i32
    %c14_i32 = arith.constant 14 : i32
    %11 = arith.minsi %10, %c14_i32 : i32
    %c0_6 = arith.constant 0 : index
    %12 = arith.index_cast %11 : i32 to index
    %c0_7 = arith.constant 0 : index
    %c0_8 = arith.constant 0 : index
    %13 = vector.load %arg2[%c0_6, %12, %c0_7, %c0_8] : memref<1x16x16x4xbf16, #tpu.memory_space<vmem>>, vector<1x2x16x4xbf16>
    %14 = vector.shape_cast %13 : vector<1x2x16x4xbf16> to vector<2x16x4xbf16>
    %15 = tpu.concatenate %9, %4, %14 in 0 : vector<2x16x4xbf16>, vector<8x16x4xbf16>, vector<2x16x4xbf16> -> vector<12x16x4xbf16>
    %c2_i32_9 = arith.constant 2 : i32
    %16 = arith.subi %1, %c2_i32_9 : i32
    %17 = tpu.iota {dimensions = array<i32: 0>} : vector<12x1x1xi32>
    %18 = vector.broadcast %16 : i32 to vector<12x1x1xi32>
    %19 = arith.addi %18, %17 : vector<12x1x1xi32>
    %c0_i32_10 = arith.constant 0 : i32
    %20 = vector.broadcast %c0_i32_10 : i32 to vector<12x1x1xi32>
    %21 = arith.cmpi sge, %19, %20 : vector<12x1x1xi32>
    %c16_i32 = arith.constant 16 : i32
    %22 = vector.broadcast %c16_i32 : i32 to vector<12x1x1xi32>
    %23 = arith.cmpi slt, %19, %22 : vector<12x1x1xi32>
    %24 = arith.andi %21, %23 : vector<12x1x1xi1>
    %c0_i32_11 = arith.constant 0 : i32
    %25 = arith.sitofp %c0_i32_11 : i32 to bf16
    %26 = vector.shape_cast %24 : vector<12x1x1xi1> to vector<12x1x1xi1>
    %27 = vector.broadcast %26 : vector<12x1x1xi1> to vector<12x16x4xi1>
    %28 = vector.broadcast %25 : bf16 to vector<12x16x4xbf16>
    %29 = arith.select %27, %15, %28 : vector<12x16x4xi1>, vector<12x16x4xbf16>
    %cst = arith.constant 0.000000e+00 : bf16
    %30 = vector.broadcast %cst : bf16 to vector<12x1x4xbf16>
    %31 = vector.extract_strided_slice %29 {offsets = [0, 0, 0], sizes = [12, 15, 4], strides = [1, 1, 1]} : vector<12x16x4xbf16> to vector<12x15x4xbf16>
    %32 = tpu.concatenate %30, %31 in 1 : vector<12x1x4xbf16>, vector<12x15x4xbf16> -> vector<12x16x4xbf16>
    %33 = vector.extract_strided_slice %29 {offsets = [0, 1, 0], sizes = [12, 15, 4], strides = [1, 1, 1]} : vector<12x16x4xbf16> to vector<12x15x4xbf16>
    %34 = tpu.concatenate %33, %30 in 1 : vector<12x15x4xbf16>, vector<12x1x4xbf16> -> vector<12x16x4xbf16>
    %35 = tpu.concatenate %32, %29, %34 in 2 : vector<12x16x4xbf16>, vector<12x16x4xbf16>, vector<12x16x4xbf16> -> vector<12x16x12xbf16>
    %cst_12 = arith.constant 0.000000e+00 : f32
    %36 = vector.broadcast %cst_12 : f32 to vector<160x4xf32>
    %37 = vector.extract_strided_slice %35 {offsets = [0, 0, 0], sizes = [10, 16, 12], strides = [1, 1, 1]} : vector<12x16x12xbf16> to vector<10x16x12xbf16>
    %38 = vector.shape_cast %37 : vector<10x16x12xbf16> to vector<160x12xbf16>
    %c0_13 = arith.constant 0 : index
    %c0_14 = arith.constant 0 : index
    %c0_15 = arith.constant 0 : index
    %39 = vector.load %arg3[%c0_13, %c0_14, %c0_15] : memref<3x12x4xbf16, #tpu.memory_space<vmem>>, vector<1x12x4xbf16>
    %40 = vector.shape_cast %39 : vector<1x12x4xbf16> to vector<12x4xbf16>
    %cst_16 = arith.constant dense<0.000000e+00> : vector<160x4xf32>
    %41 = tpu.matmul %38, %40, %cst_16 {dimension_numbers = #tpu.dot_dimension_numbers<[1], [0], [0], [1], [0, 0, 1, 1], [], []>} : vector<160x12xbf16>, vector<12x4xbf16>, vector<160x4xf32> -> vector<160x4xf32>
    %42 = arith.addf %36, %41 : vector<160x4xf32>
    %43 = vector.extract_strided_slice %35 {offsets = [1, 0, 0], sizes = [10, 16, 12], strides = [1, 1, 1]} : vector<12x16x12xbf16> to vector<10x16x12xbf16>
    %44 = vector.shape_cast %43 : vector<10x16x12xbf16> to vector<160x12xbf16>
    %c1 = arith.constant 1 : index
    %c0_17 = arith.constant 0 : index
    %c0_18 = arith.constant 0 : index
    %45 = vector.load %arg3[%c1, %c0_17, %c0_18] : memref<3x12x4xbf16, #tpu.memory_space<vmem>>, vector<1x12x4xbf16>
    %46 = vector.shape_cast %45 : vector<1x12x4xbf16> to vector<12x4xbf16>
    %cst_19 = arith.constant dense<0.000000e+00> : vector<160x4xf32>
    %47 = tpu.matmul %44, %46, %cst_19 {dimension_numbers = #tpu.dot_dimension_numbers<[1], [0], [0], [1], [0, 0, 1, 1], [], []>} : vector<160x12xbf16>, vector<12x4xbf16>, vector<160x4xf32> -> vector<160x4xf32>
    %48 = arith.addf %42, %47 : vector<160x4xf32>
    %49 = vector.extract_strided_slice %35 {offsets = [2, 0, 0], sizes = [10, 16, 12], strides = [1, 1, 1]} : vector<12x16x12xbf16> to vector<10x16x12xbf16>
    %50 = vector.shape_cast %49 : vector<10x16x12xbf16> to vector<160x12xbf16>
    %c2 = arith.constant 2 : index
    %c0_20 = arith.constant 0 : index
    %c0_21 = arith.constant 0 : index
    %51 = vector.load %arg3[%c2, %c0_20, %c0_21] : memref<3x12x4xbf16, #tpu.memory_space<vmem>>, vector<1x12x4xbf16>
    %52 = vector.shape_cast %51 : vector<1x12x4xbf16> to vector<12x4xbf16>
    %cst_22 = arith.constant dense<0.000000e+00> : vector<160x4xf32>
    %53 = tpu.matmul %50, %52, %cst_22 {dimension_numbers = #tpu.dot_dimension_numbers<[1], [0], [0], [1], [0, 0, 1, 1], [], []>} : vector<160x12xbf16>, vector<12x4xbf16>, vector<160x4xf32> -> vector<160x4xf32>
    %54 = arith.addf %48, %53 : vector<160x4xf32>
    %c0_23 = arith.constant 0 : index
    %c0_24 = arith.constant 0 : index
    %55 = vector.load %arg5[%c0_23, %c0_24] : memref<1x4xf32, #tpu.memory_space<vmem>>, vector<1x4xf32>
    %56 = vector.shape_cast %55 : vector<1x4xf32> to vector<4xf32>
    %57 = vector.shape_cast %56 : vector<4xf32> to vector<1x4xf32>
    %58 = vector.broadcast %57 : vector<1x4xf32> to vector<160x4xf32>
    %59 = arith.mulf %54, %58 : vector<160x4xf32>
    %c0_25 = arith.constant 0 : index
    %c0_26 = arith.constant 0 : index
    %60 = vector.load %arg6[%c0_25, %c0_26] : memref<1x4xf32, #tpu.memory_space<vmem>>, vector<1x4xf32>
    %61 = vector.shape_cast %60 : vector<1x4xf32> to vector<4xf32>
    %62 = vector.shape_cast %61 : vector<4xf32> to vector<1x4xf32>
    %63 = vector.broadcast %62 : vector<1x4xf32> to vector<160x4xf32>
    %64 = arith.addf %59, %63 : vector<160x4xf32>
    %cst_27 = arith.constant 0.000000e+00 : f32
    %65 = vector.broadcast %cst_27 : f32 to vector<160x4xf32>
    %66 = arith.maximumf %64, %65 : vector<160x4xf32>
    %67 = vector.shape_cast %66 : vector<160x4xf32> to vector<10x16x4xf32>
    %c1_i32 = arith.constant 1 : i32
    %68 = arith.subi %1, %c1_i32 : i32
    %69 = tpu.iota {dimensions = array<i32: 0>} : vector<10x1x1xi32>
    %70 = vector.broadcast %68 : i32 to vector<10x1x1xi32>
    %71 = arith.addi %70, %69 : vector<10x1x1xi32>
    %c0_i32_28 = arith.constant 0 : i32
    %72 = vector.broadcast %c0_i32_28 : i32 to vector<10x1x1xi32>
    %73 = arith.cmpi sge, %71, %72 : vector<10x1x1xi32>
    %c16_i32_29 = arith.constant 16 : i32
    %74 = vector.broadcast %c16_i32_29 : i32 to vector<10x1x1xi32>
    %75 = arith.cmpi slt, %71, %74 : vector<10x1x1xi32>
    %76 = arith.andi %73, %75 : vector<10x1x1xi1>
    %cst_30 = arith.constant 0.000000e+00 : f32
    %77 = vector.shape_cast %76 : vector<10x1x1xi1> to vector<10x1x1xi1>
    %78 = vector.broadcast %77 : vector<10x1x1xi1> to vector<10x16x4xi1>
    %79 = vector.broadcast %cst_30 : f32 to vector<10x16x4xf32>
    %80 = arith.select %78, %67, %79 : vector<10x16x4xi1>, vector<10x16x4xf32>
    %81 = arith.truncf %80 : vector<10x16x4xf32> to vector<10x16x4xbf16>
    %cst_31 = arith.constant 0.000000e+00 : bf16
    %82 = vector.broadcast %cst_31 : bf16 to vector<10x1x4xbf16>
    %83 = vector.extract_strided_slice %81 {offsets = [0, 0, 0], sizes = [10, 15, 4], strides = [1, 1, 1]} : vector<10x16x4xbf16> to vector<10x15x4xbf16>
    %84 = tpu.concatenate %82, %83 in 1 : vector<10x1x4xbf16>, vector<10x15x4xbf16> -> vector<10x16x4xbf16>
    %85 = vector.extract_strided_slice %81 {offsets = [0, 1, 0], sizes = [10, 15, 4], strides = [1, 1, 1]} : vector<10x16x4xbf16> to vector<10x15x4xbf16>
    %86 = tpu.concatenate %85, %82 in 1 : vector<10x15x4xbf16>, vector<10x1x4xbf16> -> vector<10x16x4xbf16>
    %87 = tpu.concatenate %84, %81, %86 in 2 : vector<10x16x4xbf16>, vector<10x16x4xbf16>, vector<10x16x4xbf16> -> vector<10x16x12xbf16>
    %cst_32 = arith.constant 0.000000e+00 : f32
    %88 = vector.broadcast %cst_32 : f32 to vector<128x4xf32>
    %89 = vector.extract_strided_slice %87 {offsets = [0, 0, 0], sizes = [8, 16, 12], strides = [1, 1, 1]} : vector<10x16x12xbf16> to vector<8x16x12xbf16>
    %90 = vector.shape_cast %89 : vector<8x16x12xbf16> to vector<128x12xbf16>
    %c0_33 = arith.constant 0 : index
    %c0_34 = arith.constant 0 : index
    %c0_35 = arith.constant 0 : index
    %91 = vector.load %arg4[%c0_33, %c0_34, %c0_35] : memref<3x12x4xbf16, #tpu.memory_space<vmem>>, vector<1x12x4xbf16>
    %92 = vector.shape_cast %91 : vector<1x12x4xbf16> to vector<12x4xbf16>
    %cst_36 = arith.constant dense<0.000000e+00> : vector<128x4xf32>
    %93 = tpu.matmul %90, %92, %cst_36 {dimension_numbers = #tpu.dot_dimension_numbers<[1], [0], [0], [1], [0, 0, 1, 1], [], []>} : vector<128x12xbf16>, vector<12x4xbf16>, vector<128x4xf32> -> vector<128x4xf32>
    %94 = arith.addf %88, %93 : vector<128x4xf32>
    %95 = vector.extract_strided_slice %87 {offsets = [1, 0, 0], sizes = [8, 16, 12], strides = [1, 1, 1]} : vector<10x16x12xbf16> to vector<8x16x12xbf16>
    %96 = vector.shape_cast %95 : vector<8x16x12xbf16> to vector<128x12xbf16>
    %c1_37 = arith.constant 1 : index
    %c0_38 = arith.constant 0 : index
    %c0_39 = arith.constant 0 : index
    %97 = vector.load %arg4[%c1_37, %c0_38, %c0_39] : memref<3x12x4xbf16, #tpu.memory_space<vmem>>, vector<1x12x4xbf16>
    %98 = vector.shape_cast %97 : vector<1x12x4xbf16> to vector<12x4xbf16>
    %cst_40 = arith.constant dense<0.000000e+00> : vector<128x4xf32>
    %99 = tpu.matmul %96, %98, %cst_40 {dimension_numbers = #tpu.dot_dimension_numbers<[1], [0], [0], [1], [0, 0, 1, 1], [], []>} : vector<128x12xbf16>, vector<12x4xbf16>, vector<128x4xf32> -> vector<128x4xf32>
    %100 = arith.addf %94, %99 : vector<128x4xf32>
    %101 = vector.extract_strided_slice %87 {offsets = [2, 0, 0], sizes = [8, 16, 12], strides = [1, 1, 1]} : vector<10x16x12xbf16> to vector<8x16x12xbf16>
    %102 = vector.shape_cast %101 : vector<8x16x12xbf16> to vector<128x12xbf16>
    %c2_41 = arith.constant 2 : index
    %c0_42 = arith.constant 0 : index
    %c0_43 = arith.constant 0 : index
    %103 = vector.load %arg4[%c2_41, %c0_42, %c0_43] : memref<3x12x4xbf16, #tpu.memory_space<vmem>>, vector<1x12x4xbf16>
    %104 = vector.shape_cast %103 : vector<1x12x4xbf16> to vector<12x4xbf16>
    %cst_44 = arith.constant dense<0.000000e+00> : vector<128x4xf32>
    %105 = tpu.matmul %102, %104, %cst_44 {dimension_numbers = #tpu.dot_dimension_numbers<[1], [0], [0], [1], [0, 0, 1, 1], [], []>} : vector<128x12xbf16>, vector<12x4xbf16>, vector<128x4xf32> -> vector<128x4xf32>
    %106 = arith.addf %100, %105 : vector<128x4xf32>
    %107 = vector.shape_cast %4 : vector<8x16x4xbf16> to vector<128x4xbf16>
    %108 = arith.extf %107 : vector<128x4xbf16> to vector<128x4xf32>
    %c0_45 = arith.constant 0 : index
    %c0_46 = arith.constant 0 : index
    %109 = vector.load %arg7[%c0_45, %c0_46] : memref<1x4xf32, #tpu.memory_space<vmem>>, vector<1x4xf32>
    %110 = vector.shape_cast %109 : vector<1x4xf32> to vector<4xf32>
    %111 = vector.shape_cast %110 : vector<4xf32> to vector<1x4xf32>
    %112 = vector.broadcast %111 : vector<1x4xf32> to vector<128x4xf32>
    %113 = arith.mulf %106, %112 : vector<128x4xf32>
    %c0_47 = arith.constant 0 : index
    %c0_48 = arith.constant 0 : index
    %114 = vector.load %arg8[%c0_47, %c0_48] : memref<1x4xf32, #tpu.memory_space<vmem>>, vector<1x4xf32>
    %115 = vector.shape_cast %114 : vector<1x4xf32> to vector<4xf32>
    %116 = vector.shape_cast %115 : vector<4xf32> to vector<1x4xf32>
    %117 = vector.broadcast %116 : vector<1x4xf32> to vector<128x4xf32>
    %118 = arith.addf %113, %117 : vector<128x4xf32>
    %119 = arith.addf %118, %108 : vector<128x4xf32>
    %cst_49 = arith.constant 0.000000e+00 : f32
    %120 = vector.broadcast %cst_49 : f32 to vector<128x4xf32>
    %121 = arith.maximumf %119, %120 : vector<128x4xf32>
    %122 = vector.shape_cast %121 : vector<128x4xf32> to vector<1x8x16x4xf32>
    %c0_50 = arith.constant 0 : index
    %c0_51 = arith.constant 0 : index
    %c0_52 = arith.constant 0 : index
    %c0_53 = arith.constant 0 : index
    %123 = vector.load %arg9[%c0_50, %c0_51, %c0_52, %c0_53] : memref<1x8x16x4xf32, #tpu.memory_space<vmem>>, vector<1x8x16x4xf32>
    tpu.vector_store %arg9[%c0_50, %c0_51, %c0_52, %c0_53], %122 {strides = array<i32>} : memref<1x8x16x4xf32, #tpu.memory_space<vmem>>, vector<1x8x16x4xf32>,
    return
  }
  func.func @transform_0(%arg0: i32, %arg1: i32) -> (i32, i32, i32, i32) {
    %c0_i32 = arith.constant 0 : i32
    %c0_i32_0 = arith.constant 0 : i32
    %c0_i32_1 = arith.constant 0 : i32
    %c0_i32_2 = arith.constant 0 : i32
    return %arg0, %c0_i32, %c0_i32_0, %c0_i32_1 : i32, i32, i32, i32
  }
  func.func @transform_1(%arg0: i32, %arg1: i32) -> (i32, i32, i32) {
    %c0_i32 = arith.constant 0 : i32
    %c0_i32_0 = arith.constant 0 : i32
    %c0_i32_1 = arith.constant 0 : i32
    %c0_i32_2 = arith.constant 0 : i32
    return %c0_i32, %c0_i32_0, %c0_i32_1 : i32, i32, i32
  }
  func.func @transform_2(%arg0: i32, %arg1: i32) -> (i32, i32, i32) {
    %c0_i32 = arith.constant 0 : i32
    %c0_i32_0 = arith.constant 0 : i32
    %c0_i32_1 = arith.constant 0 : i32
    %c0_i32_2 = arith.constant 0 : i32
    return %c0_i32, %c0_i32_0, %c0_i32_1 : i32, i32, i32
  }
  func.func @transform_3(%arg0: i32, %arg1: i32) -> (i32, i32) {
    %c0_i32 = arith.constant 0 : i32
    %c0_i32_0 = arith.constant 0 : i32
    %c0_i32_1 = arith.constant 0 : i32
    return %c0_i32, %c0_i32_0 : i32, i32
  }
  func.func @transform_4(%arg0: i32, %arg1: i32) -> (i32, i32) {
    %c0_i32 = arith.constant 0 : i32
    %c0_i32_0 = arith.constant 0 : i32
    %c0_i32_1 = arith.constant 0 : i32
    return %c0_i32, %c0_i32_0 : i32, i32
  }
  func.func @transform_5(%arg0: i32, %arg1: i32) -> (i32, i32) {
    %c0_i32 = arith.constant 0 : i32
    %c0_i32_0 = arith.constant 0 : i32
    %c0_i32_1 = arith.constant 0 : i32
    return %c0_i32, %c0_i32_0 : i32, i32
  }
  func.func @transform_6(%arg0: i32, %arg1: i32) -> (i32, i32) {
    %c0_i32 = arith.constant 0 : i32
    %c0_i32_0 = arith.constant 0 : i32
    %c0_i32_1 = arith.constant 0 : i32
    return %c0_i32, %c0_i32_0 : i32, i32
  }
  func.func @transform_7(%arg0: i32, %arg1: i32) -> (i32, i32, i32, i32) {
    %c0_i32 = arith.constant 0 : i32
    %c0_i32_0 = arith.constant 0 : i32
    %c0_i32_1 = arith.constant 0 : i32
    return %arg0, %arg1, %c0_i32, %c0_i32_0 : i32, i32, i32, i32
  }
}

</mosaic_0001>

<bundles_post_ra>
// kernel: tpu_custom_call.1
= control target key start
LH: loop header
LB: loop body
LE: loop exit
PB: predicated region body
PF: predicated region fallthrough
CT: control target
= control target key end

     0   :  { %s2169_s24 = smov 0   ;;  %s2171_s25 = smov 0   ;;  %s3110_s0 = inlined_call_operand.vmem [shape: bf16[2,16,16,4], index: 0, kind: input, shape index: {}]   ;;  %s3111_s1 = inlined_call_operand.vmem [shape: bf16[3,12,4], index: 1, kind: input, shape index: {}]   ;;  %s3112_s2 = inlined_call_operand.vmem [shape: bf16[3,12,4], index: 2, kind: input, shape index: {}]   ;;  %s3113_s3 = inlined_call_operand.vmem [shape: f32[1,4], index: 3, kind: input, shape index: {}]   ;;  %s3114_s4 = inlined_call_operand.vmem [shape: f32[1,4], index: 4, kind: input, shape index: {}]   ;;  %s3115_s5 = inlined_call_operand.vmem [shape: f32[1,4], index: 5, kind: input, shape index: {}]   ;;  %s3116_s6 = inlined_call_operand.vmem [shape: f32[1,4], index: 6, kind: input, shape index: {}]   ;;  %s3117_s7 = inlined_call_operand.vmem [shape: f32[2,16,16,4], index: 7, kind: output, shape index: {}]  }
   0x1   :  { %s2173_s26 = smov 0   ;;  %s2175_s27 = smov 0  }
   0x2   :  { %s2177_s28 = smov 0  }
   0x3 LB: > { %s26_s29 = sadd.s32 1, %s2117_s26  ;;  %s29_s30 = sadd.s32 1, %s2121_s27  ;;  %s2125_s28 = sphi %s2177_s28, %s17_s28   ;;  %s2121_s27 = sphi %s2175_s27, %s3135_s27   ;;  %s2117_s26 = sphi %s2173_s26, %s3134_s26   ;;  %s2113_s25 = sphi %s2171_s25, %s3133_s25   ;;  %s2109_s24 = sphi %s2169_s24, %s3132_s24  }
   0x4   : > { %p27_p0 = scmp.ge.s32.totalorder %s26_s29, 2  ;;  %p1908_p1 = scmp.ge.s32.totalorder %s2125_s28, 1 }
   0x5   : > { %p251_p2 = scmp.lt.s32.totalorder %s2125_s28, 5 }
   0x6   : > { %s3137_s29 = smov (%p27_p0, %s26_s29), 0  ;;  %s3139_s30 = smov (!%p27_p0, %s29_s30), %s2121_s27 }
   0x7   : > { %p252_p3 = pnand %p1908_p1, %p251_p2  ;;  %p31_p4 = scmp.ge.s32.totalorder %s3139_s30, 2 }
   0x8   : > { %p288_p5 = scmp.lt.s32.totalorder (!%p252_p3), %s2113_s25, 1  ;;  %s2202_s8 = sshll.u32 (!%p252_p3), %s2109_s24, 3 }
   0x9   : > { %s3141_s30 = smov (%p31_p4, %s3139_s30), 0  ;;  %255 = sbr.rel (%p252_p3) target bundleno = 959 (0x3bf), region = 48 }
   0xa   : > { %s2205_s9 = sadd.s32 (!%p252_p3), 4294967294, %s2202_s8  ;;  %s2014_s10 = sshll.u32 (!%p252_p3), %s2109_s24, 6 }
   0xb   : > { %s335_s15 = sadd.s32 (!%p252_p3), 8, %s2202_s8  ;;  %p326_p7 = scmp.gt.s32.totalorder (!%p252_p3), %s2205_s9, 0 }
   0xc   : > { %p336_p6 = scmp.lt.s32.totalorder (!%p252_p3), %s335_s15, 14  ;;  %s2127_s19 = smov (!%p252_p3), 4  }
   0xd   : > { %s2128_s22 = smov (!%p252_p3), 8   ;;  %p296_p8 = scmp.lt.s32.totalorder (!%p252_p3), %s2202_s8, 15 }
   0xe   : > { %s3143_s25 = smov (!%p288_p5, %s2113_s25), 1  ;;  %v2210_v0 = vstv %s2205_s9  ;;  %s3145_s15 = smov (!%p336_p6, %s335_s15), 14  ;;  %vm648_vm11 = vcmask 1047552   ;;  %vm649_vm12 = vsmask.f32 7424 }
   0xf   : > { %v352_v1 = vadd.s32 7, %v2210_v0  ;;  %v353_v2 = vadd.s32 8, %v2210_v0  ;;  %v355_v3 = vadd.s32 10, %v2210_v0  ;;  %v347_v4 = vadd.s32 2, %v2210_v0  ;;  %s2012_s11 = sshll.u32 %s3143_s25, 7  ;;  %s2016_s17 = sshll.u32 %s3145_s15, 3 }
  0x10   : > { %v354_v5 = vadd.s32 9, %v2210_v0  ;;  %s2222_s14 = scalar_lea.vmem %s3110_s0, %s2012_s11  ;;  %s3147_s9 = smov (!%p326_p7, %s2205_s9), 0 }
  0x11   : > { %vm364_vm0 = vcmp.ge.s32.totalorder %v352_v1, 0  ;;  %vm376_vm1 = vcmp.lt.s32.totalorder %v352_v1, 16  ;;  %vm365_vm2 = vcmp.ge.s32.totalorder %v353_v2, 0  ;;  %vm377_vm3 = vcmp.lt.s32.totalorder %v353_v2, 16  ;;  %s2226_s16 = scalar_lea.vmem %s2222_s14, %s2014_s10  ;;  %s2248_s18 = scalar_lea.vmem %s2222_s14, %s2016_s17 }
  0x12   : > { %vm388_vm4 = vmand %vm364_vm0, %vm376_vm1  ;;  %vm367_vm5 = vcmp.ge.s32.totalorder %v355_v3, 0  ;;  %vm379_vm6 = vcmp.lt.s32.totalorder %v355_v3, 16  ;;  %vm359_vm7 = vcmp.ge.s32.totalorder %v347_v4, 0  ;;  %vm371_vm8 = vcmp.lt.s32.totalorder %v347_v4, 16  ;;  %v319_v6 = vld [vmem:[%s2226_s16 + $0x28] sm:$0xf] }
  0x13   : > { %v320_v7 = vld [vmem:[%s2226_s16 + $0x2c] sm:$0xf]  ;;  %v321_v8 = vld [vmem:[%s2226_s16 + $0x30] sm:$0xf]  ;;  %v431_v9 = vsel %vm388_vm4, %v319_v6, 0  ;;  %vm389_vm9 = vmand %vm365_vm2, %vm377_vm3  ;;  %vm366_vm14 = vcmp.ge.s32.totalorder %v354_v5, 0 }
  0x14   : > { %v432_v10 = vsel %vm388_vm4, %v320_v7, 0  ;;  %v322_v11 = vld [vmem:[%s2226_s16 + $0x34] sm:$0xf]  ;;  %v479_v12 = vunpack.c.l.b16 %v431_v9  ;;  %v433_v14 = vsel %vm389_vm9, %v321_v8, 0  ;;  %vm2236_vm10 = vmand %vm367_vm5, %vm379_vm6  ;;  %v309_v17 = vld [vmem:[%s2226_s16] sm:$0xf] }
  0x15   : > { %v480_v13 = vunpack.c.l.b16 %v432_v10  ;;  %v434_v15 = vsel %vm389_vm9, %v322_v11, 0  ;;  %v310_v18 = vld [vmem:[%s2226_s16 + $0x4] sm:$0xf]  ;;  %v481_v19 = vunpack.c.l.b16 %v433_v14  ;;  %vm383_vm13 = vmand %vm359_vm7, %vm371_vm8  ;;  %v323_v24 = vld [vmem:[%s2226_s16 + $0x38] sm:$0xf]  ;;  %vm378_vm15 = vcmp.lt.s32.totalorder %v354_v5, 16 }
  0x16   : > { %v482_v20 = vunpack.c.l.b16 %v434_v15  ;;  %v421_v22 = vsel %vm383_vm13, %v309_v17, 0  ;;  %v422_v23 = vsel %vm383_vm13, %v310_v18, 0  ;;  %v341_v26 = vld [vmem:[%s2248_s18] sm:$0xf]  ;;  %v342_v27 = vld [vmem:[%s2248_s18 + $0x4] sm:$0xf]  ;;  %vm2266_vm0 = vmand %vm366_vm14, %vm378_vm15 }
  0x17   : > { %v2245_v21 = vpack.c.b16 %v480_v13, %v479_v12  ;;  %v469_v28 = vunpack.c.l.b16 %v421_v22  ;;  %v470_v29 = vunpack.c.l.b16 %v422_v23  ;;  %v437_v32 = vsel %vm2236_vm10, %v341_v26, 0  ;;  %v324_v34 = vld [vmem:[%s2226_s16 + $0x3c] sm:$0xf]  ;;  %s2015_s20 = sshll.u32 %s3147_s9, 3  ;;  %vm2285_vm3 = vmand %vm648_vm11, %vm649_vm12  ;;  %v311_v13 = vld [vmem:[%s2226_s16 + $0x8] sm:$0xf] }
  0x18   : > { %v2251_v25 = vpack.c.b16 %v482_v20, %v481_v19  ;;  %v438_v33 = vsel %vm2236_vm10, %v342_v27, 0  ;;  %v485_v38 = vunpack.c.l.b16 %v437_v32  ;;  %v435_v41 = vsel %vm2266_vm0, %v323_v24, 0  ;;  %s2279_s21 = scalar_lea.vmem %s2222_s14, %s2015_s20  ;;  %v312_v14 = vld [vmem:[%s2226_s16 + $0xc] sm:$0xf]  ;;  %s1969_s11 = sadd.s32 4294967295, %s2202_s8 }
  0x19   : > { %677 = vrot.lane.b32.xlu0 %v2245_v21, %s2127_s19  ;;  %v551_v30 = vshrl.u32 %v2245_v21, 16  ;;  %v554_v31 = vshll.u32 %v2245_v21, 16  ;;  %v486_v39 = vunpack.c.l.b16 %v438_v33  ;;  %vm357_vm1 = vcmp.ge.s32.totalorder %v2210_v0, 0  ;;  %v331_v53 = vld [vmem:[%s2279_s21] sm:$0xf]  ;;  %s3149_s8 = smov (!%p296_p8, %s2202_s8), 15 }
  0x1a   : > { %679 = vrot.lane.b32.xlu1 %v2251_v25, %s2127_s19  ;;  %v558_v36 = vshrl.u32 %v2251_v25, 16  ;;  %v561_v37 = vshll.u32 %v2251_v25, 16  ;;  %vm369_vm2 = vcmp.lt.s32.totalorder %v2210_v0, 16  ;;  %v2293_v45 = vpack.c.b16 %v470_v29, %v469_v28  ;;  %v332_v54 = vld [vmem:[%s2279_s21 + $0x4] sm:$0xf] }
  0x1b   : > { %v626_v40 = vrot.slane %v554_v31, 1  ;;  %v2291_v44 = vpack.c.b16 %v486_v39, %v485_v38  ;;  %v436_v46 = vsel %vm2266_vm0, %v324_v34, 0  ;;  %v483_v48 = vunpack.c.l.b16 %v435_v41  ;;  %vm381_vm4 = vmand %vm357_vm1, %vm369_vm2  ;;  %v333_v8 = vld [vmem:[%s2279_s21 + $0x8] sm:$0xf]  ;;  %v334_v9 = vld [vmem:[%s2279_s21 + $0xc] sm:$0xf] }
  0x1c   : > { %v628_v43 = vrot.slane %v561_v37, 1  ;;  %v484_v52 = vunpack.c.l.b16 %v436_v46  ;;  %v519_v58 = vshll.u32 %v2293_v45, 16  ;;  %v417_v60 = vsel %vm381_vm4, %v331_v53, 0  ;;  %v313_v34 = vld [vmem:[%s2226_s16 + $0x10] sm:$0xf] }
  0x1d   : > { %v627_v47 = vor.u32 %v626_v40, %v551_v30  ;;  %v572_v50 = vshrl.u32 %v2291_v44, 16  ;;  %v575_v51 = vshll.u32 %v2291_v44, 16  ;;  %v418_v61 = vsel %vm381_vm4, %v332_v54, 0  ;;  %v315_v39 = vld [vmem:[%s2226_s16 + $0x18] sm:$0xf] }
  0x1e   : > { %v629_v49 = vor.u32 %v628_v43, %v558_v36  ;;  %v2314_v59 = vpack.c.b16 %v484_v52, %v483_v48  ;;  %v465_v63 = vunpack.c.l.b16 %v417_v60  ;;  %v466_v1 = vunpack.c.l.b16 %v418_v61  ;;  %v314_v52 = vld [vmem:[%s2226_s16 + $0x14] sm:$0xf] }
  0x1f   : > { %v658_v55 = vsel %vm2285_vm3, %v627_v47, 0  ;;  %v632_v57 = vrot.slane %v575_v51, 1  ;;  %v346_v4 = vadd.s32 1, %v2210_v0  ;;  %v348_v5 = vadd.s32 3, %v2210_v0 }
  0x20   : > { %v659_v56 = vsel %vm2285_vm3, %v629_v49, 0  ;;  %681 = vrot.lane.b32.xlu2 %v2314_v59, %s2127_s19  ;;  %v565_v2 = vshrl.u32 %v2314_v59, 16  ;;  %v568_v3 = vshll.u32 %v2314_v59, 16  ;;  %v516_v6 = vshrl.u32 %v2293_v45, 16  ;;  %v316_v49 = vld [vmem:[%s2226_s16 + $0x1c] sm:$0xf] }
  0x21   : > { %713 = vrot.lane.b32.xlu0 %v658_v55, %s2128_s22  ;;  %v633_v62 = vor.u32 %v632_v57, %v572_v50  ;;  %v616_v7 = vrot.slane %v519_v58, 1  ;;  %vm358_vm5 = vcmp.ge.s32.totalorder %v346_v4, 0  ;;  %vm370_vm6 = vcmp.lt.s32.totalorder %v346_v4, 16  ;;  %v317_v4 = vld [vmem:[%s2226_s16 + $0x20] sm:$0xf] }
  0x22   : > { %715 = vrot.lane.b32.xlu1 %v659_v56, %s2128_s22  ;;  %v630_v10 = vrot.slane %v568_v3, 1  ;;  %vm360_vm7 = vcmp.ge.s32.totalorder %v348_v5, 0  ;;  %v2335_v12 = vpack.c.b16 %v466_v1, %v465_v63  ;;  %vm382_vm8 = vmand %vm358_vm5, %vm370_vm6  ;;  %vm372_vm9 = vcmp.lt.s32.totalorder %v348_v5, 16  ;;  %v318_v5 = vld [vmem:[%s2226_s16 + $0x24] sm:$0xf] }
  0x23   : > { %v661_v11 = vsel %vm2285_vm3, %v633_v62, 0  ;;  %v419_v16 = vsel %vm382_vm8, %v333_v8, 0  ;;  %v420_v17 = vsel %vm382_vm8, %v334_v9, 0  ;;  %vm384_vm10 = vmand %vm360_vm7, %vm372_vm9  ;;  %v349_v18 = vadd.s32 4, %v2210_v0 }
  0x24   : > { %v631_v15 = vor.u32 %v630_v10, %v565_v2  ;;  %v467_v19 = vunpack.c.l.b16 %v419_v16  ;;  %v468_v20 = vunpack.c.l.b16 %v420_v17  ;;  %v617_v22 = vor.u32 %v616_v7, %v516_v6  ;;  %v1957_v7 = vld [vmem:[%s3111_s1 + $0x10] sm:$0xf] }
  0x25   : > { %v423_v24 = vsel %vm384_vm10, %v311_v13, 0  ;;  %v424_v26 = vsel %vm384_vm10, %v312_v14, 0  ;;  %v505_v27 = vshll.u32 %v2335_v12, 16  ;;  %vm361_vm11 = vcmp.ge.s32.totalorder %v349_v18, 0 }
  0x26   : > { %v660_v23 = vsel %vm2285_vm3, %v631_v15, 0  ;;  %v2351_v28 = vpack.c.b16 %v468_v20, %v467_v19  ;;  %v471_v29 = vunpack.c.l.b16 %v423_v24  ;;  %v472_v32 = vunpack.c.l.b16 %v424_v26 }
  0x27   : > { %vm373_vm12 = vcmp.lt.s32.totalorder %v349_v18, 16  ;;  %v653_v35 = vsel %vm2285_vm3, %v617_v22, 0  ;;  %v502_v38 = vshrl.u32 %v2335_v12, 16  ;;  %v350_v40 = vadd.s32 5, %v2210_v0 }
  0x28   : > { %717 = vrot.lane.b32.xlu2 %v660_v23, %s2128_s22  ;;  %v512_v33 = vshll.u32 %v2351_v28, 16  ;;  %v612_v41 = vrot.slane %v505_v27, 1  ;;  %v509_v43 = vshrl.u32 %v2351_v28, 16  ;;  %v2365_v47 = vpack.c.b16 %v472_v32, %v471_v29  ;;  %vm2367_vm13 = vmand %vm361_vm11, %vm373_vm12 }
  0x29   : > { %683 = vrot.lane.b32.xlu0 %v2291_v44, %s2127_s19  ;;  %vm362_vm14 = vcmp.ge.s32.totalorder %v350_v40, 0  ;;  %vm374_vm15 = vcmp.lt.s32.totalorder %v350_v40, 16  ;;  %v351_v53 = vadd.s32 6, %v2210_v0  ;;  %v425_v54 = vsel %vm2367_vm13, %v313_v34, 0 }
  0x2a   : > { %719 = vrot.lane.b32.xlu1 %v661_v11, %s2128_s22  ;;  %v614_v46 = vrot.slane %v512_v33, 1  ;;  %vm386_vm0 = vmand %vm362_vm14, %vm374_vm15  ;;  %v613_v57 = vor.u32 %v612_v41, %v502_v38  ;;  %v526_v61 = vshll.u32 %v2365_v47, 16  ;;  %v426_v62 = vsel %vm2367_vm13, %v314_v52, 0 }
  0x2b   : > { %v427_v55 = vsel %vm386_vm0, %v315_v39, 0  ;;  %v428_v56 = vsel %vm386_vm0, %v316_v49, 0  ;;  %vm363_vm1 = vcmp.ge.s32.totalorder %v351_v53, 0  ;;  %vm375_vm2 = vcmp.lt.s32.totalorder %v351_v53, 16 }
  0x2c   : > { %v615_v60 = vor.u32 %v614_v46, %v509_v43  ;;  %v475_v63 = vunpack.c.l.b16 %v427_v55  ;;  %v476_v1 = vunpack.c.l.b16 %v428_v56  ;;  %vm2390_vm4 = vmand %vm363_vm1, %vm375_vm2  ;;  %v473_v8 = vunpack.c.l.b16 %v425_v54  ;;  %v1927_v56 = vld [vmem:[%s3111_s1 + $0x8] sm:$0xf] }
  0x2d   : > { %v474_v9 = vunpack.c.l.b16 %v426_v62  ;;  %v651_v10 = vsel %vm2285_vm3, %v613_v57, 0  ;;  %v523_v11 = vshrl.u32 %v2365_v47, 16  ;;  %v618_v13 = vrot.slane %v526_v61, 1  ;;  %v2018_v57 = vld [vmem:[%s3111_s1 + $0x8] sm:$0x30] }
  0x2e   : > { %v652_v14 = vsel %vm2285_vm3, %v615_v60, 0  ;;  %v2401_v15 = vpack.c.b16 %v476_v1, %v475_v63  ;;  %v429_v16 = vsel %vm2390_vm4, %v317_v4, 0  ;;  %v430_v17 = vsel %vm2390_vm4, %v318_v5, 0  ;;  %v1941_v63 = vld [vmem:[%s3111_s1] sm:$0xf] }
  0x2f   : > { %v2408_v18 = vpack.c.b16 %v474_v9, %v473_v8  ;;  %v619_v19 = vor.u32 %v618_v13, %v523_v11  ;;  %v477_v20 = vunpack.c.l.b16 %v429_v16  ;;  %v478_v22 = vunpack.c.l.b16 %v430_v17  ;;  %v2017_v1 = vld [vmem:[%s3111_s1] sm:$0x30]  ;;  %v2019_v8 = vld [vmem:[%s3111_s1 + $0x10] sm:$0x30] }
  0x30   : > { %667 = vrot.lane.b32.xlu2 %v2293_v45, %s2127_s19  ;;  %v540_v23 = vshll.u32 %v2401_v15, 16  ;;  %v537_v32 = vshrl.u32 %v2401_v15, 16  ;;  %vm816_vm5 = vcmask 1045504   ;;  %v1928_v60 = vor.u32 %v2018_v57, %v1927_v56 }
  0x31   : > { %703 = vrot.lane.b32.xlu0 %v653_v35, %s2128_s22  ;;  %v533_v24 = vshll.u32 %v2408_v18, 16  ;;  %v654_v26 = vsel %vm2285_vm3, %v619_v19, 0  ;;  %v2419_v29 = vpack.c.b16 %v478_v22, %v477_v20  ;;  %v530_v35 = vshrl.u32 %v2408_v18, 16 }
  0x32   : > { %663 = vrot.lane.b32.xlu1 %v2335_v12, %s2127_s19  ;;  %v622_v34 = vrot.slane %v540_v23, 1  ;;  %v818_v62 = vsel %vm816_vm5, %v1928_v60, 0  ;;  %v1942_v4 = vor.u32 %v2017_v1, %v1941_v63  ;;  %v1958_v9 = vor.u32 %v2019_v8, %v1957_v7 }
  0x33   : > { %v620_v39 = vrot.slane %v533_v24, 1  ;;  %v547_v40 = vshll.u32 %v2419_v29, 16  ;;  %v544_v48 = vshrl.u32 %v2419_v29, 16  ;;  %2023 = vmatpush.bf16.msra.mxu1 %v818_v62  ;;  %827 = vmatpush.bf16.msra.mxu0 %v818_v62  ;;  %vm597_vm6 = vcmask 1040384  }
  0x34   : > { %v623_v41 = vor.u32 %v622_v34, %v537_v32  ;;  %v887_v5 = vsel %vm816_vm5, %v1942_v4, 0  ;;  %vm598_vm7 = vsmask.f32 256  ;;  %vm723_vm9 = vcmask 31744  }
  0x35   : > { %v621_v46 = vor.u32 %v620_v39, %v530_v35  ;;  %v624_v49 = vrot.slane %v547_v40, 1  ;;  %vm2480_vm8 = vmand %vm597_vm6, %vm598_vm7  ;;  %vm760_vm10 = vcmask 64512   ;;  %vm795_vm11 = vcmask 97280  }
  0x36   : > { %v656_v52 = vsel %vm2285_vm3, %v623_v41, 0  ;;  %v518_v41 = vrot.slane %v516_v6, 7  ;;  %v546_v12 = vrot.slane %v544_v48, 7 }
  0x37   : > { %v655_v53 = vsel %vm2285_vm3, %v621_v46, 0  ;;  %v625_v54 = vor.u32 %v624_v49, %v544_v48  ;;  %896 = vmatpush.bf16.msrb.mxu1 %v887_v5 }
  0x38   : > { %665 = vrot.lane.b32.xlu2 %v2351_v28, %s2127_s19  ;;  %v525_v28 = vrot.slane %v523_v11, 7 }
  0x39   : > { %699 = vrot.lane.b32.xlu0 %v651_v10, %s2128_s22  ;;  %v657_v55 = vsel %vm2285_vm3, %v625_v54, 0  ;;  %v959_v10 = vsel %vm816_vm5, %v1958_v9, 0 }
  0x3a   : > { %701 = vrot.lane.b32.xlu1 %v652_v14, %s2128_s22  ;;  %968 = vmatpush.bf16.msra.mxu2 %v959_v10  ;;  %v553_v14 = vrot.slane %v551_v30, 7  ;;  %v528_v4 = vor.u32 %v526_v61, %v525_v28  ;;  %v532_v61 = vrot.slane %v530_v35, 7 }
  0x3c   : > { %v556_v17 = vor.u32 %v554_v31, %v553_v14  ;;  %v560_v31 = vrot.slane %v558_v36, 7  ;;  %v511_v36 = vrot.slane %v509_v43, 7  ;;  %v567_v43 = vrot.slane %v565_v2, 7 }
  0x3d   : > { %v603_v11 = vsel %vm2480_vm8, 0, %v528_v4 }
  0x3e   : > { %v607_v22 = vsel %vm2480_vm8, 0, %v556_v17  ;;  %v563_v46 = vor.u32 %v561_v37, %v560_v31  ;;  %v514_v45 = vor.u32 %v512_v33, %v511_v36  ;;  %v570_v63 = vor.u32 %v568_v3, %v567_v43 }
  0x3f   : > { %v535_v17 = vor.u32 %v533_v24, %v532_v61  ;;  %v504_v24 = vrot.slane %v502_v38, 7 }
  0x40   : > { %669 = vrot.lane.b32.xlu2 %v2365_v47, %s2127_s19  ;;  %v601_v33 = vsel %vm2480_vm8, 0, %v514_v45  ;;  %v609_v2 = vsel %vm2480_vm8, 0, %v570_v63  ;;  %v574_v47 = vrot.slane %v572_v50, 7 }
  0x41   : > { %705 = vrot.lane.b32.xlu0 %v654_v26, %s2128_s22 }
  0x42   : > { %671 = vrot.lane.b32.xlu1 %v2408_v18, %s2127_s19  ;;  %v539_v18 = vrot.slane %v537_v32, 7 }
  0x48   : > { %707 = vrot.lane.b32.xlu2 %v655_v53, %s2128_s22 }
  0x49   : > { %673 = vrot.lane.b32.xlu0 %v2401_v15, %s2127_s19 }
  0x4a   : > { %709 = vrot.lane.b32.xlu1 %v656_v52, %s2128_s22  ;;  %v521_v52 = vor.u32 %v519_v58, %v518_v41 }
  0x4c   : > { %v602_v56 = vsel %vm2480_vm8, 0, %v521_v52 }
  0x50   : > { %675 = vrot.lane.b32.xlu2 %v2419_v29, %s2127_s19 }
  0x51   : > { %711 = vrot.lane.b32.xlu0 %v657_v55, %s2128_s22  ;;  %v608_v55 = vsel %vm2480_vm8, 0, %v563_v46 }
  0x7a   : > { %v682_v13 = vpop.permute.xlu2 %681 }
  0x7b   : > { %v753_v59 = vsel %vm723_vm9, %v609_v2, %v682_v13  ;;  %v577_v13 = vor.u32 %v575_v51, %v574_v47  ;;  %v2643_v2 = vstv %s1969_s11 }
  0x7c   : > { %vm1119_vm12 = vcmp.ge.s32.totalorder %v2643_v2, 0  ;;  %vm1129_vm13 = vcmp.lt.s32.totalorder %v2643_v2, 16 }
  0x7d   : > { %v610_v50 = vsel %vm2480_vm8, 0, %v577_v13  ;;  %vm1139_vm14 = vmand %vm1119_vm12, %vm1129_vm13 }
  0x82   : > { %v718_v26 = vpop.permute.xlu2 %717 }
  0x83   : > { %v2544_v14 = vsel %vm760_vm10, %v753_v59, %v718_v26 }
  0x8a   : > { %v668_v49 = vpop.permute.xlu2 %667 }
  0x8b   : > { %v678_v16 = vpop.permute.xlu0 %677  ;;  %v732_v25 = vsel %vm723_vm9, %v602_v56, %v668_v49 }
  0x8c   : > { %v680_v19 = vpop.permute.xlu1 %679  ;;  %v747_v30 = vsel %vm723_vm9, %v607_v22, %v678_v16 }
  0x8d   : > { %v750_v6 = vsel %vm723_vm9, %v608_v55, %v680_v19  ;;  %v604_v19 = vsel %vm2480_vm8, 0, %v535_v17 }
  0x92   : > { %v666_v60 = vpop.permute.xlu2 %665 }
  0x93   : > { %v714_v34 = vpop.permute.xlu0 %713  ;;  %v729_v1 = vsel %vm723_vm9, %v601_v33, %v666_v60 }
  0x94   : > { %v2488_v39 = vsel %vm760_vm10, %v747_v30, %v714_v34  ;;  %v716_v21 = vpop.permute.xlu1 %715  ;;  %v542_v34 = vor.u32 %v540_v23, %v539_v18  ;;  %v549_v23 = vor.u32 %v547_v40, %v546_v12 }
  0x95   : > { %1935 = vmatmul.msk.bf16.vlgmr.msra.gmra.mxu1 %vm795_vm11, %v2488_v39  ;;  %v2511_v58 = vsel %vm760_vm10, %v750_v6, %v716_v21  ;;  %v507_v21 = vor.u32 %v505_v27, %v504_v24  ;;  %v1110_v24 = vadd.s32 1, %v2643_v2 }
  0x96   : > { %v605_v31 = vsel %vm2480_vm8, 0, %v542_v34  ;;  %v606_v52 = vsel %vm2480_vm8, 0, %v549_v23 }
  0x97   : > { %v600_v32 = vsel %vm2480_vm8, 0, %v507_v21  ;;  %vm1120_vm15 = vcmp.ge.s32.totalorder %v1110_v24, 0  ;;  %vm1130_vm0 = vcmp.lt.s32.totalorder %v1110_v24, 16 }
  0x98   : > { %vm1140_vm1 = vmand %vm1120_vm15, %vm1130_vm0 }
  0x9a   : > { %v670_v9 = vpop.permute.xlu2 %669 }
  0x9b   : > { %v684_v53 = vpop.permute.xlu0 %683  ;;  %v735_v3 = vsel %vm723_vm9, %v603_v11, %v670_v9 }
  0x9c   : > { %v720_v54 = vpop.permute.xlu1 %719  ;;  %v756_v22 = vsel %vm723_vm9, %v610_v50, %v684_v53 }
  0x9d   : > { %v782_v44 = vsel %vm760_vm10, %v756_v22, %v720_v54 }
  0xa2   : > { %v708_v30 = vpop.permute.xlu2 %707 }
  0xa3   : > { %v704_v37 = vpop.permute.xlu0 %703 }
  0xa4   : > { %v2514_v57 = vsel %vm760_vm10, %v732_v25, %v704_v37  ;;  %v664_v62 = vpop.permute.xlu1 %663 }
  0xa5   : > { %1936 = vmatmul.msk.bf16.gmra.mxu1 %vm795_vm11, %v2511_v58  ;;  %1959 = vmatmul.msk.bf16.vlgmr.msra.gmra.mxu2 %vm795_vm11, %v2514_v57  ;;  %v726_v38 = vsel %vm723_vm9, %v600_v32, %v664_v62 }
  0xaa   : > { %v676_v53 = vpop.permute.xlu2 %675 }
  0xab   : > { %v700_v5 = vpop.permute.xlu0 %699  ;;  %v744_v54 = vsel %vm723_vm9, %v606_v52, %v676_v53 }
  0xac   : > { %v702_v7 = vpop.permute.xlu1 %701  ;;  %v762_v27 = vsel %vm760_vm10, %v726_v38, %v700_v5  ;;  %v2632_v5 = vld [vmem:[%s3113_s3] ss:$0 sm:$0xff] }
  0xad   : > { %v764_v8 = vsel %vm760_vm10, %v729_v1, %v702_v7 }
  0xae   : > { %1929 = vmatmul.msk.bf16.vlgmr.msra.gmra.mxu0 %vm795_vm11, %v764_v8 }
  0xb3   : > { %v706_v10 = vpop.permute.xlu0 %705 }
  0xb4   : > { %v768_v16 = vsel %vm760_vm10, %v735_v3, %v706_v10  ;;  %v672_v35 = vpop.permute.xlu1 %671 }
  0xb5   : > { %1937 = vmatmul.msk.bf16.gmra.mxu1 %vm795_vm11, %v2544_v14  ;;  %1960 = vmatmul.msk.bf16.gmra.mxu2 %vm795_vm11, %v768_v16  ;;  %v738_v26 = vsel %vm723_vm9, %v604_v19, %v672_v35 }
  0xb6   : > { %v770_v51 = vsel %vm760_vm10, %v738_v26, %v708_v30 }
  0xbb   : > { %v674_v41 = vpop.permute.xlu0 %673 }
  0xbc   : > { %v741_v46 = vsel %vm723_vm9, %v605_v31, %v674_v41  ;;  %v710_v49 = vpop.permute.xlu1 %709 }
  0xbd   : > { %v772_v15 = vsel %vm760_vm10, %v741_v46, %v710_v49 }
  0xbe   : > { %1930 = vmatmul.msk.bf16.gmra.mxu0 %vm795_vm11, %v2514_v57 }
  0xc3   : > { %v712_v55 = vpop.permute.xlu0 %711 }
  0xc4   : > { %v774_v48 = vsel %vm760_vm10, %v744_v54, %v712_v55 }
  0xc5   : > { %1938 = vmatmul.msk.bf16.gmra.mxu1 %vm795_vm11, %v782_v44  ;;  %1961 = vmatmul.msk.bf16.gmra.mxu2 %vm795_vm11, %v770_v51 }
  0xce   : > { %1931 = vmatmul.msk.bf16.gmra.mxu0 %vm795_vm11, %v768_v16 }
  0xd5   : > { %1943 = vmatmul.msk.bf16.vlgmr.msrb.gmra.mxu1 %vm795_vm11, %v762_v27  ;;  %1962 = vmatmul.msk.bf16.gmra.mxu2 %vm795_vm11, %v772_v15 }
  0xde   : > { %1932 = vmatmul.msk.bf16.gmra.mxu0 %vm795_vm11, %v770_v51 }
  0xe5   : > { %1944 = vmatmul.msk.bf16.gmra.mxu1 %vm795_vm11, %v764_v8  ;;  %1963 = vmatmul.msk.bf16.gmra.mxu2 %vm795_vm11, %v774_v48  ;;  %v2637_v8 = vld [vmem:[%s3114_s4] ss:$0 sm:$0xff] }
  0xee   : > { %1933 = vmatmul.msk.bf16.gmra.mxu0 %vm795_vm11, %v772_v15 }
  0xf5   : > { %1945 = vmatmul.msk.bf16.gmra.mxu1 %vm795_vm11, %v2514_v57  ;;  %1964 = vmatmul.msk.bf16.gmra.mxu2 %vm795_vm11, %v2488_v39 }
  0xfe   : > { %1934 = vmatmul.msk.bf16.gmra.mxu0 %vm795_vm11, %v774_v48 }
 0x105   : > { %1946 = vmatmul.msk.bf16.gmra.mxu1 %vm795_vm11, %v768_v16  ;;  %1965 = vmatmul.msk.bf16.gmra.mxu2 %vm795_vm11, %v2511_v58 }
 0x112   : > { %v2605_v29 = vpop.f32.mrf.mxu1 }
 0x115   : > { %1947 = vmatmul.msk.bf16.gmra.mxu1 %vm795_vm11, %v770_v51  ;;  %1966 = vmatmul.msk.bf16.gmra.mxu2 %vm795_vm11, %v2544_v14 }
 0x11a   : > { %v2610_v40 = vpop.f32.mrf.mxu1 }
 0x122   : > { %v2612_v56 = vpop.f32.mrf.mxu1 }
 0x125   : > { %1948 = vmatmul.msk.bf16.gmra.mxu1 %vm795_vm11, %v772_v15  ;;  %1967 = vmatmul.msk.bf16.gmra.mxu2 %vm795_vm11, %v782_v44 }
 0x128   : > { %v970_v6 = vpop.f32.mrf.mxu2 }
 0x12a   : > { %v2616_v36 = vpop.f32.mrf.mxu1 }
 0x12b   : > { %v829_v57 = vpop.f32.mrf.mxu0 }
 0x130   : > { %v972_v45 = vpop.f32.mrf.mxu2 }
 0x132   : > { %v2618_v25 = vpop.f32.mrf.mxu1 }
 0x133   : > { %v831_v43 = vpop.f32.mrf.mxu0 }
 0x135   : > { %1949 = vmatmul.msk.bf16.gmra.mxu1 %vm795_vm11, %v774_v48 }
 0x138   : > { %v975_v62 = vpop.f32.mrf.mxu2 }
 0x13a   : > { %v2621_v37 = vpop.f32.mrf.mxu1 }
 0x13b   : > { %v834_v63 = vpop.f32.mrf.mxu0 }
 0x140   : > { %v977_v33 = vpop.f32.mrf.mxu2 }
 0x142   : > { %v2623_v60 = vpop.f32.mrf.mxu1 }
 0x143   : > { %v836_v3 = vpop.f32.mrf.mxu0 }
 0x145   : > { %1950 = vmatmul.msk.bf16.gmra.mxu1 %vm795_vm11, %v2488_v39 }
 0x148   : > { %v980_v9 = vpop.f32.mrf.mxu2 }
 0x14a   : > { %v2627_v28 = vpop.f32.mrf.mxu1 }
 0x14b   : > { %v839_v50 = vpop.f32.mrf.mxu0 }
 0x150   : > { %v982_v22 = vpop.f32.mrf.mxu2 }
 0x152   : > { %v898_v1 = vpop.f32.mrf.mxu1 }
 0x153   : > { %v899_v4 = vadd.f32 %v898_v1, %v829_v57  ;;  %v841_v38 = vpop.f32.mrf.mxu0  ;;  %v356_v57 = vadd.s32 11, %v2210_v0 }
 0x155   : > { %v1020_v7 = vadd.f32 %v970_v6, %v899_v4  ;;  %1951 = vmatmul.msk.bf16.gmra.mxu1 %vm795_vm11, %v2511_v58  ;;  %vm368_vm2 = vcmp.ge.s32.totalorder %v356_v57, 0  ;;  %vm380_vm4 = vcmp.lt.s32.totalorder %v356_v57, 16 }
 0x156   : > { %vm392_vm6 = vmand %vm368_vm2, %vm380_vm4 }
 0x157   : > { %v1044_v39 = vmul.f32 %v2632_v5, %v1020_v7  ;;  %v1111_v7 = vadd.s32 2, %v2643_v2 }
 0x158   : > { %v985_v12 = vpop.f32.mrf.mxu2 }
 0x159   : > { %v1068_v11 = vadd.f32 %v2637_v8, %v1044_v39  ;;  %v343_v39 = vld [vmem:[%s2248_s18 + $0x8] sm:$0xf]  ;;  %vm1121_vm7 = vcmp.ge.s32.totalorder %v1111_v7, 0  ;;  %vm1131_vm12 = vcmp.lt.s32.totalorder %v1111_v7, 16 }
 0x15a   : > { %v900_v59 = vpop.f32.mrf.mxu1  ;;  %vm1141_vm13 = vmand %vm1121_vm7, %vm1131_vm12 }
 0x15b   : > { %v901_v10 = vadd.f32 %v900_v59, %v831_v43  ;;  %v1088_v47 = vmax.f32 %v1068_v11, 0.0  ;;  %v844_v1 = vpop.f32.mrf.mxu0  ;;  %v344_v11 = vld [vmem:[%s2248_s18 + $0xc] sm:$0xf] }
 0x15d   : > { %v1021_v61 = vadd.f32 %v972_v45, %v901_v10  ;;  %v1169_v13 = vsel %vm1139_vm14, %v1088_v47, 0.0  ;;  %v440_v10 = vsel %vm392_vm6, %v344_v11, 0 }
 0x15e   : > { %v1189_v26 = vpack.c.bf16 %v1169_v13, %v1169_v13 }
 0x15f   : > { %v1045_v58 = vmul.f32 %v2632_v5, %v1021_v61 }
 0x160   : > { %v1229_v34 = vunpack.c.l.b16 %v1189_v26  ;;  %v987_v59 = vpop.f32.mrf.mxu2 }
 0x161   : > { %v1069_v16 = vadd.f32 %v2637_v8, %v1045_v58  ;;  %v488_v58 = vunpack.c.l.b16 %v440_v10 }
 0x162   : > { %v903_v17 = vpop.f32.mrf.mxu1 }
 0x163   : > { %v1089_v35 = vmax.f32 %v1069_v16, 0.0  ;;  %v904_v19 = vadd.f32 %v903_v17, %v834_v63  ;;  %v846_v24 = vpop.f32.mrf.mxu0 }
 0x165   : > { %v1022_v30 = vadd.f32 %v975_v62, %v904_v19  ;;  %1952 = vmatmul.msk.bf16.gmra.mxu1 %vm795_vm11, %v2544_v14  ;;  %v1170_v44 = vsel %vm1139_vm14, %v1089_v35, 0.0 }
 0x166   : > { %v1190_v51 = vpack.c.bf16 %v1170_v44, %v1170_v44 }
 0x167   : > { %v1046_v18 = vmul.f32 %v2632_v5, %v1022_v30 }
 0x168   : > { %v1230_v21 = vunpack.c.l.b16 %v1190_v51 }
 0x169   : > { %v1070_v31 = vadd.f32 %v2637_v8, %v1046_v18 }
 0x16a   : > { %v905_v41 = vpop.f32.mrf.mxu1  ;;  %v2655_v32 = vpack.c.b16 %v1230_v21, %v1229_v34 }
 0x16b   : > { %v906_v46 = vadd.f32 %v905_v41, %v836_v3  ;;  %v1090_v14 = vmax.f32 %v1070_v31, 0.0  ;;  %v439_v3 = vsel %vm392_vm6, %v343_v39, 0 }
 0x16c   : > { %v1260_v49 = vshrl.u32 %v2655_v32, 16  ;;  %v1263_v23 = vshll.u32 %v2655_v32, 16 }
 0x16d   : > { %v1023_v15 = vadd.f32 %v977_v33, %v906_v46  ;;  %v1171_v55 = vsel %vm1140_vm1, %v1090_v14, 0.0 }
 0x16e   : > { %v1262_v27 = vrot.slane %v1260_v49, 7  ;;  %v1191_v62 = vpack.c.bf16 %v1171_v55, %v1171_v55 }
 0x16f   : > { %v1047_v52 = vmul.f32 %v2632_v5, %v1023_v15 }
 0x170   : > { %v2664_v53 = vor.u32 %v1263_v23, %v1262_v27  ;;  %v1231_v47 = vunpack.c.l.b16 %v1191_v62 }
 0x171   : > { %v1071_v54 = vadd.f32 %v2637_v8, %v1047_v52 }
 0x172   : > { %v908_v48 = vpop.f32.mrf.mxu1 }
 0x173   : > { %v1091_v6 = vmax.f32 %v1071_v54, 0.0  ;;  %v909_v45 = vadd.f32 %v908_v48, %v839_v50  ;;  %v1112_v54 = vadd.s32 3, %v2643_v2 }
 0x175   : > { %v1024_v43 = vadd.f32 %v980_v9, %v909_v45  ;;  %v1172_v33 = vsel %vm1140_vm1, %v1091_v6, 0.0  ;;  %v487_v9 = vunpack.c.l.b16 %v439_v3  ;;  %vm1122_vm14 = vcmp.ge.s32.totalorder %v1112_v54, 0 }
 0x176   : > { %v1192_v63 = vpack.c.bf16 %v1172_v33, %v1172_v33  ;;  %vm1132_vm15 = vcmp.lt.s32.totalorder %v1112_v54, 16  ;;  %v849_v33 = vpop.f32.mrf.mxu0 }
 0x177   : > { %v1048_v4 = vmul.f32 %v2632_v5, %v1024_v43  ;;  %v2675_v50 = vpack.c.b16 %v488_v58, %v487_v9  ;;  %vm1142_vm0 = vmand %vm1122_vm14, %vm1132_vm15 }
 0x178   : > { %v1232_v61 = vunpack.c.l.b16 %v1192_v63 }
 0x179   : > { %v1072_v0 = vadd.f32 %v2637_v8, %v1048_v4  ;;  %685 = vrot.lane.b32.xlu0 %v2675_v50, %s2127_s19 }
 0x17a   : > { %v910_v16 = vpop.f32.mrf.mxu1  ;;  %v2673_v13 = vpack.c.b16 %v1232_v61, %v1231_v47 }
 0x17b   : > { %v911_v17 = vadd.f32 %v910_v16, %v841_v38  ;;  %v1092_v19 = vmax.f32 %v1072_v0, 0.0  ;;  %v582_v16 = vshll.u32 %v2675_v50, 16 }
 0x17c   : > { %v1267_v35 = vshrl.u32 %v2673_v13, 16  ;;  %v1270_v44 = vshll.u32 %v2673_v13, 16 }
 0x17d   : > { %v1025_v26 = vadd.f32 %v982_v22, %v911_v17  ;;  %v1173_v34 = vsel %vm1141_vm13, %v1092_v19, 0.0  ;;  %v990_v22 = vpop.f32.mrf.mxu2 }
 0x17e   : > { %v1269_v30 = vrot.slane %v1267_v35, 7  ;;  %v1193_v38 = vpack.c.bf16 %v1173_v34, %v1173_v34  ;;  %v851_v19 = vpop.f32.mrf.mxu0 }
 0x17f   : > { %v1049_v51 = vmul.f32 %v2632_v5, %v1025_v26 }
 0x180   : > { %v2686_v18 = vor.u32 %v1270_v44, %v1269_v30  ;;  %v1233_v55 = vunpack.c.l.b16 %v1193_v38 }
 0x181   : > { %v1073_v21 = vadd.f32 %v2637_v8, %v1049_v51  ;;  %v1113_v51 = vadd.s32 4, %v2643_v2 }
 0x182   : > { %v913_v31 = vpop.f32.mrf.mxu1 }
 0x183   : > { %v1093_v41 = vmax.f32 %v1073_v21, 0.0  ;;  %v914_v46 = vadd.f32 %v913_v31, %v844_v1  ;;  %v579_v31 = vshrl.u32 %v2675_v50, 16  ;;  %vm1123_vm1 = vcmp.ge.s32.totalorder %v1113_v51, 0 }
 0x184   : > { %vm1133_vm2 = vcmp.lt.s32.totalorder %v1113_v51, 16 }
 0x185   : > { %v1174_v14 = vsel %vm1141_vm13, %v1093_v41, 0.0  ;;  %v1026_v15 = vadd.f32 %v985_v12, %v914_v46  ;;  %v992_v43 = vpop.f32.mrf.mxu2  ;;  %v634_v41 = vrot.slane %v582_v16, 1  ;;  %vm2714_vm4 = vmand %vm1123_vm1, %vm1133_vm2 }
 0x186   : > { %v1194_v27 = vpack.c.bf16 %v1174_v14, %v1174_v14 }
 0x187   : > { %v1050_v52 = vmul.f32 %v2632_v5, %v1026_v15  ;;  %v635_v54 = vor.u32 %v634_v41, %v579_v31 }
 0x188   : > { %v1234_v48 = vunpack.c.l.b16 %v1194_v27 }
 0x189   : > { %v1074_v6 = vadd.f32 %v2637_v8, %v1050_v52 }
 0x18a   : > { %v915_v45 = vpop.f32.mrf.mxu1  ;;  %v2692_v57 = vpack.c.b16 %v1234_v48, %v1233_v55  ;;  %v854_v55 = vpop.f32.mrf.mxu0 }
 0x18b   : > { %v916_v62 = vadd.f32 %v915_v45, %v846_v24  ;;  %v1094_v12 = vmax.f32 %v1074_v6, 0.0 }
 0x18c   : > { %v1274_v63 = vshrl.u32 %v2692_v57, 16  ;;  %v1277_v7 = vshll.u32 %v2692_v57, 16 }
 0x18d   : > { %v1027_v1 = vadd.f32 %v987_v59, %v916_v62  ;;  %v1175_v10 = vsel %vm1142_vm0, %v1094_v12, 0.0  ;;  %v995_v17 = vpop.f32.mrf.mxu2 }
 0x18e   : > { %v1276_v4 = vrot.slane %v1274_v63, 7  ;;  %v1195_v9 = vpack.c.bf16 %v1175_v10, %v1175_v10 }
 0x18f   : > { %v1051_v39 = vmul.f32 %v2632_v5, %v1027_v1 }
 0x190   : > { %v2701_v11 = vor.u32 %v1277_v7, %v1276_v4  ;;  %v1235_v24 = vunpack.c.l.b16 %v1195_v9 }
 0x191   : > { %v1075_v3 = vadd.f32 %v2637_v8, %v1051_v39 }
 0x192   : > { %v918_v47 = vpop.f32.mrf.mxu1 }
 0x193   : > { %v1095_v61 = vmax.f32 %v1075_v3, 0.0  ;;  %v919_v0 = vadd.f32 %v918_v47, %v849_v33 }
 0x195   : > { %v1028_v59 = vadd.f32 %v990_v22, %v919_v0  ;;  %v1176_v58 = vsel %vm1142_vm0, %v1095_v61, 0.0  ;;  %v997_v33 = vpop.f32.mrf.mxu2 }
 0x196   : > { %v1196_v26 = vpack.c.bf16 %v1176_v58, %v1176_v58 }
 0x197   : > { %v1052_v30 = vmul.f32 %v2632_v5, %v1028_v59 }
 0x198   : > { %v1236_v34 = vunpack.c.l.b16 %v1196_v26  ;;  %v1114_v26 = vadd.s32 5, %v2643_v2 }
 0x199   : > { %v1076_v21 = vadd.f32 %v2637_v8, %v1052_v30  ;;  %v856_v30 = vpop.f32.mrf.mxu0 }
 0x19a   : > { %v920_v22 = vpop.f32.mrf.mxu1  ;;  %v1252_v46 = vpack.c.b16 %v1236_v34, %v1235_v24  ;;  %vm1124_vm6 = vcmp.ge.s32.totalorder %v1114_v26, 0  ;;  %vm1134_vm7 = vcmp.lt.s32.totalorder %v1114_v26, 16 }
 0x19b   : > { %v921_v38 = vadd.f32 %v920_v22, %v851_v19  ;;  %v1096_v27 = vmax.f32 %v1076_v21, 0.0  ;;  %vm1144_vm12 = vmand %vm1124_vm6, %vm1134_vm7 }
 0x19c   : > { %1395 = vrot.lane.b32.xlu1 %v1252_v46, %s2127_s19  ;;  %v1281_v14 = vshrl.u32 %v1252_v46, 16  ;;  %v1284_v15 = vshll.u32 %v1252_v46, 16 }
 0x19d   : > { %v1029_v52 = vadd.f32 %v992_v43, %v921_v38  ;;  %v662_v43 = vsel %vm2285_vm3, %v635_v54, 0  ;;  %v1177_v39 = vsel %vm2714_vm4, %v1096_v27, 0.0  ;;  %v1000_v21 = vpop.f32.mrf.mxu2 }
 0x19e   : > { %v1355_v48 = vrot.slane %v1284_v15, 1  ;;  %v1283_v6 = vrot.slane %v1281_v14, 7  ;;  %v1197_v0 = vpack.c.bf16 %v1177_v39, %v1177_v39 }
 0x19f   : > { %v1053_v62 = vmul.f32 %v2632_v5, %v1029_v52 }
 0x1a0   : > { %v1356_v12 = vor.u32 %v1355_v48, %v1281_v14  ;;  %v2719_v1 = vor.u32 %v1284_v15, %v1283_v6  ;;  %v1237_v51 = vunpack.c.l.b16 %v1197_v0  ;;  %v1115_v0 = vadd.s32 6, %v2643_v2 }
 0x1a1   : > { %v1077_v4 = vadd.f32 %v2637_v8, %v1053_v62 }
 0x1a2   : > { %v923_v3 = vpop.f32.mrf.mxu1  ;;  %v1382_v10 = vsel %vm2285_vm3, %v1356_v12, 0  ;;  %vm1125_vm13 = vcmp.ge.s32.totalorder %v1115_v0, 0  ;;  %vm1135_vm14 = vcmp.lt.s32.totalorder %v1115_v0, 16 }
 0x1a3   : > { %v1097_v47 = vmax.f32 %v1077_v4, 0.0  ;;  %v924_v61 = vadd.f32 %v923_v3, %v854_v55  ;;  %1425 = vrot.lane.b32.xlu2 %v1382_v10, %s2128_s22  ;;  %vm1145_vm15 = vmand %vm1125_vm13, %vm1135_vm14 }
 0x1a4   : > { %721 = vrot.lane.b32.xlu1 %v662_v43, %s2128_s22 }
 0x1a5   : > { %v1030_v9 = vadd.f32 %v995_v17, %v924_v61  ;;  %v1178_v59 = vsel %vm2714_vm4, %v1097_v47, 0.0 }
 0x1a6   : > { %v1198_v58 = vpack.c.bf16 %v1178_v59, %v1178_v59 }
 0x1a7   : > { %v1054_v19 = vmul.f32 %v2632_v5, %v1030_v9 }
 0x1a8   : > { %v1238_v24 = vunpack.c.l.b16 %v1198_v58 }
 0x1a9   : > { %v1078_v34 = vadd.f32 %v2637_v8, %v1054_v19 }
 0x1aa   : > { %v925_v41 = vpop.f32.mrf.mxu1  ;;  %v1253_v22 = vpack.c.b16 %v1238_v24, %v1237_v51 }
 0x1ab   : > { %v926_v46 = vadd.f32 %v925_v41, %v856_v30  ;;  %v1098_v14 = vmax.f32 %v1078_v34, 0.0 }
 0x1ac   : > { %1397 = vrot.lane.b32.xlu2 %v1253_v22, %s2127_s19  ;;  %v1288_v17 = vshrl.u32 %v1253_v22, 16  ;;  %v1291_v38 = vshll.u32 %v1253_v22, 16 }
 0x1ad   : > { %v1031_v15 = vadd.f32 %v997_v33, %v926_v46  ;;  %v1179_v45 = vsel %vm1144_vm12, %v1098_v14, 0.0  ;;  %v1002_v33 = vpop.f32.mrf.mxu2 }
 0x1ae   : > { %v1357_v27 = vrot.slane %v1291_v38, 1  ;;  %v1290_v52 = vrot.slane %v1288_v17, 7  ;;  %v1199_v39 = vpack.c.bf16 %v1179_v45, %v1179_v45 }
 0x1af   : > { %v1055_v54 = vmul.f32 %v2632_v5, %v1031_v15 }
 0x1b0   : > { %v1358_v55 = vor.u32 %v1357_v27, %v1288_v17  ;;  %v2737_v48 = vor.u32 %v1291_v38, %v1290_v52  ;;  %v1239_v9 = vunpack.c.l.b16 %v1199_v39 }
 0x1b1   : > { %v1079_v6 = vadd.f32 %v2637_v8, %v1055_v54 }
 0x1b2   : > { %v928_v62 = vpop.f32.mrf.mxu1  ;;  %v1383_v12 = vsel %vm2285_vm3, %v1358_v55, 0 }
 0x1b3   : > { %v1099_v4 = vmax.f32 %v1079_v6, 0.0  ;;  %v929_v43 = vadd.f32 %v928_v62, %v2605_v29  ;;  %1427 = vrot.lane.b32.xlu0 %v1383_v12, %s2128_s22 }
 0x1b5   : > { %v1032_v3 = vadd.f32 %v1000_v21, %v929_v43  ;;  %v1180_v10 = vsel %vm1144_vm12, %v1099_v4, 0.0  ;;  %v1005_v21 = vpop.f32.mrf.mxu2  ;;  %v1116_v4 = vadd.s32 7, %v2643_v2 }
 0x1b6   : > { %v1200_v47 = vpack.c.bf16 %v1180_v10, %v1180_v10 }
 0x1b7   : > { %v1056_v61 = vmul.f32 %v2632_v5, %v1032_v3  ;;  %vm1126_vm0 = vcmp.ge.s32.totalorder %v1116_v4, 0  ;;  %vm1136_vm1 = vcmp.lt.s32.totalorder %v1116_v4, 16 }
 0x1b8   : > { %v1240_v59 = vunpack.c.l.b16 %v1200_v47  ;;  %vm1146_vm2 = vmand %vm1126_vm0, %vm1136_vm1 }
 0x1b9   : > { %v1080_v58 = vadd.f32 %v2637_v8, %v1056_v61 }
 0x1ba   : > { %v930_v19 = vpop.f32.mrf.mxu1  ;;  %v1254_v26 = vpack.c.b16 %v1240_v59, %v1239_v9 }
 0x1bb   : > { %v931_v30 = vadd.f32 %v930_v19, %v2610_v40  ;;  %v1100_v24 = vmax.f32 %v1080_v58, 0.0 }
 0x1bc   : > { %1399 = vrot.lane.b32.xlu1 %v1254_v26, %s2127_s19  ;;  %v1295_v29 = vshrl.u32 %v1254_v26, 16  ;;  %v1298_v51 = vshll.u32 %v1254_v26, 16 }
 0x1bd   : > { %v1033_v34 = vadd.f32 %v1002_v33, %v931_v30  ;;  %v1181_v40 = vsel %vm1145_vm15, %v1100_v24, 0.0  ;;  %v1007_v43 = vpop.f32.mrf.mxu2 }
 0x1be   : > { %v1359_v41 = vrot.slane %v1298_v51, 1  ;;  %v1297_v22 = vrot.slane %v1295_v29, 7  ;;  %v1201_v55 = vpack.c.bf16 %v1181_v40, %v1181_v40 }
 0x1bf   : > { %v1057_v46 = vmul.f32 %v2632_v5, %v1033_v34 }
 0x1c0   : > { %v1360_v17 = vor.u32 %v1359_v41, %v1295_v29  ;;  %v2750_v38 = vor.u32 %v1298_v51, %v1297_v22  ;;  %v1241_v33 = vunpack.c.l.b16 %v1201_v55 }
 0x1c1   : > { %v1081_v14 = vadd.f32 %v2637_v8, %v1057_v46 }
 0x1c2   : > { %v933_v15 = vpop.f32.mrf.mxu1  ;;  %v1384_v27 = vsel %vm2285_vm3, %v1360_v17, 0 }
 0x1c3   : > { %v1101_v52 = vmax.f32 %v1081_v14, 0.0  ;;  %v934_v54 = vadd.f32 %v933_v15, %v2612_v56  ;;  %1429 = vrot.lane.b32.xlu2 %v1384_v27, %s2128_s22  ;;  %v1117_v27 = vadd.s32 8, %v2643_v2 }
 0x1c5   : > { %v1034_v6 = vadd.f32 %v1005_v21, %v934_v54  ;;  %v1182_v45 = vsel %vm1145_vm15, %v1101_v52, 0.0  ;;  %vm1127_vm4 = vcmp.ge.s32.totalorder %v1117_v27, 0  ;;  %vm1137_vm6 = vcmp.lt.s32.totalorder %v1117_v27, 16 }
 0x1c6   : > { %v1202_v62 = vpack.c.bf16 %v1182_v45, %v1182_v45  ;;  %vm1147_vm7 = vmand %vm1127_vm4, %vm1137_vm6 }
 0x1c7   : > { %v1058_v12 = vmul.f32 %v2632_v5, %v1034_v6 }
 0x1c8   : > { %v1242_v39 = vunpack.c.l.b16 %v1202_v62 }
 0x1c9   : > { %v1082_v3 = vadd.f32 %v2637_v8, %v1058_v12 }
 0x1ca   : > { %v935_v10 = vpop.f32.mrf.mxu1  ;;  %v1255_v47 = vpack.c.b16 %v1242_v39, %v1241_v33 }
 0x1cb   : > { %v936_v61 = vadd.f32 %v935_v10, %v2616_v36  ;;  %v1102_v9 = vmax.f32 %v1082_v3, 0.0  ;;  %v1010_v36 = vpop.f32.mrf.mxu2 }
 0x1cc   : > { %1401 = vrot.lane.b32.xlu0 %v1255_v47, %s2127_s19  ;;  %v1302_v56 = vshrl.u32 %v1255_v47, 16  ;;  %v1305_v0 = vshll.u32 %v1255_v47, 16 }
 0x1cd   : > { %v1035_v59 = vadd.f32 %v1007_v43, %v936_v61  ;;  %v1183_v24 = vsel %vm1146_vm2, %v1102_v9, 0.0 }
 0x1ce   : > { %v1304_v58 = vrot.slane %v1302_v56, 7  ;;  %v1361_v19 = vrot.slane %v1305_v0, 1  ;;  %v1203_v46 = vpack.c.bf16 %v1183_v24, %v1183_v24 }
 0x1cf   : > { %v1059_v26 = vmul.f32 %v2632_v5, %v1035_v59 }
 0x1d0   : > { %v1362_v30 = vor.u32 %v1361_v19, %v1302_v56  ;;  %v2763_v29 = vor.u32 %v1305_v0, %v1304_v58  ;;  %v1243_v52 = vunpack.c.l.b16 %v1203_v46 }
 0x1d1   : > { %v1083_v51 = vadd.f32 %v2637_v8, %v1059_v26  ;;  %v1974_v26 = vld [vmem:[%s3112_s2 + $0x8] sm:$0xf] }
 0x1d2   : > { %v938_v34 = vpop.f32.mrf.mxu1  ;;  %v1385_v21 = vsel %vm2285_vm3, %v1362_v30, 0  ;;  %v2021_v30 = vld [vmem:[%s3112_s2 + $0x8] sm:$0x30] }
 0x1d3   : > { %v1103_v41 = vmax.f32 %v1083_v51, 0.0  ;;  %v939_v22 = vadd.f32 %v938_v34, %v2618_v25  ;;  %1431 = vrot.lane.b32.xlu1 %v1385_v21, %s2128_s22  ;;  %v1012_v25 = vpop.f32.mrf.mxu2  ;;  %v1353_v21 = vrot.slane %v1277_v7, 1 }
 0x1d5   : > { %v1036_v17 = vadd.f32 %v1010_v36, %v939_v22  ;;  %v1184_v14 = vsel %vm1146_vm2, %v1103_v41, 0.0  ;;  %v1975_v36 = vor.u32 %v2021_v30, %v1974_v26  ;;  %v1349_v22 = vrot.slane %v1263_v23, 1 }
 0x1d6   : > { %v1204_v40 = vpack.c.bf16 %v1184_v14, %v1184_v14  ;;  %v1354_v14 = vor.u32 %v1353_v21, %v1274_v63 }
 0x1d7   : > { %v1060_v15 = vmul.f32 %v2632_v5, %v1036_v17  ;;  %v1516_v41 = vsel %vm816_vm5, %v1975_v36, 0  ;;  %v1350_v7 = vor.u32 %v1349_v22, %v1260_v49 }
 0x1d8   : > { %v1244_v54 = vunpack.c.l.b16 %v1204_v40  ;;  %2024 = vmatpush.bf16.msra.mxu3 %v1516_v41  ;;  %1525 = vmatpush.bf16.msrb.mxu2 %v1516_v41  ;;  %v1381_v23 = vsel %vm2285_vm3, %v1354_v14, 0 }
 0x1d9   : > { %v1084_v55 = vadd.f32 %v2637_v8, %v1060_v15  ;;  %v1379_v63 = vsel %vm2285_vm3, %v1350_v7, 0 }
 0x1da   : > { %v940_v6 = vpop.f32.mrf.mxu1  ;;  %v1256_v45 = vpack.c.b16 %v1244_v54, %v1243_v52 }
 0x1db   : > { %v941_v62 = vadd.f32 %v940_v6, %v2621_v37  ;;  %v1104_v43 = vmax.f32 %v1084_v55, 0.0  ;;  %v581_v6 = vrot.slane %v579_v31, 7 }
 0x1dc   : > { %1403 = vrot.lane.b32.xlu2 %v1256_v45, %s2127_s19  ;;  %v1309_v12 = vshrl.u32 %v1256_v45, 16  ;;  %v1312_v4 = vshll.u32 %v1256_v45, 16 }
 0x1dd   : > { %v1037_v33 = vadd.f32 %v1012_v25, %v941_v62  ;;  %v1185_v37 = vsel %vm1147_vm7, %v1104_v43, 0.0 }
 0x1de   : > { %v1311_v39 = vrot.slane %v1309_v12, 7  ;;  %v1363_v3 = vrot.slane %v1312_v4, 1  ;;  %v1205_v59 = vpack.c.bf16 %v1185_v37, %v1185_v37 }
 0x1df   : > { %v1061_v10 = vmul.f32 %v2632_v5, %v1037_v33 }
 0x1e0   : > { %v1364_v47 = vor.u32 %v1363_v3, %v1309_v12  ;;  %v2776_v61 = vor.u32 %v1312_v4, %v1311_v39  ;;  %v1245_v51 = vunpack.c.l.b16 %v1205_v59  ;;  %v1343_v4 = vsel %vm2480_vm8, 0, %v2737_v48  ;;  %v1986_v48 = vld [vmem:[%s3112_s2] sm:$0xf]  ;;  %v2000_v59 = vld [vmem:[%s3112_s2 + $0x10] sm:$0xf] }
 0x1e1   : > { %v1085_v56 = vadd.f32 %v2637_v8, %v1061_v10  ;;  %v1344_v10 = vsel %vm2480_vm8, 0, %v2750_v38 }
 0x1e2   : > { %v1386_v0 = vsel %vm2285_vm3, %v1364_v47, 0  ;;  %v1346_v41 = vsel %vm2480_vm8, 0, %v2776_v61  ;;  %v1341_v61 = vsel %vm2480_vm8, 0, %v2701_v11 }
 0x1e3   : > { %v1105_v9 = vmax.f32 %v1085_v56, 0.0  ;;  %1433 = vrot.lane.b32.xlu0 %v1386_v0, %s2128_s22  ;;  %v2020_v0 = vld [vmem:[%s3112_s2] sm:$0x30] }
 0x1e5   : > { %v1186_v58 = vsel %vm1147_vm7, %v1105_v9, 0.0  ;;  %v1987_v9 = vor.u32 %v2020_v0, %v1986_v48 }
 0x1e6   : > { %v1206_v19 = vpack.c.bf16 %v1186_v58, %v1186_v58  ;;  %v2022_v58 = vld [vmem:[%s3112_s2 + $0x10] sm:$0x30] }
 0x1e7   : > { %v1575_v38 = vsel %vm816_vm5, %v1987_v9, 0 }
 0x1e8   : > { %v1246_v24 = vunpack.c.l.b16 %v1206_v19  ;;  %1584 = vmatpush.bf16.msrb.mxu3 %v1575_v38  ;;  %v2001_v19 = vor.u32 %v2022_v58, %v2000_v59 }
 0x1ea   : > { %v1257_v34 = vpack.c.b16 %v1246_v24, %v1245_v51  ;;  %v1637_v26 = vsel %vm816_vm5, %v2001_v19, 0  ;;  %v1345_v51 = vsel %vm2480_vm8, 0, %v2763_v29 }
 0x1eb   : > { %1389 = vrot.lane.b32.xlu0 %v2655_v32, %s2127_s19  ;;  %v1351_v32 = vrot.slane %v1270_v44, 1  ;;  %v584_v44 = vor.u32 %v582_v16, %v581_v6  ;;  %v686_v25 = vpop.permute.xlu0 %685  ;;  %1646 = vmatpush.bf16.msrb.mxu0 %v1637_v26 }
 0x1ec   : > { %1405 = vrot.lane.b32.xlu1 %v1257_v34, %s2127_s19  ;;  %v1316_v46 = vshrl.u32 %v1257_v34, 16  ;;  %v1319_v17 = vshll.u32 %v1257_v34, 16 }
 0x1ed   : > { %v1352_v49 = vor.u32 %v1351_v32, %v1267_v35  ;;  %v611_v31 = vsel %vm2480_vm8, 0, %v584_v44 }
 0x1ee   : > { %v1318_v40 = vrot.slane %v1316_v46, 7  ;;  %v1365_v15 = vrot.slane %v1319_v17, 1  ;;  %v759_v50 = vsel %vm723_vm9, %v611_v31, %v686_v25 }
 0x1ef   : > { %v1380_v55 = vsel %vm2285_vm3, %v1352_v49, 0 }
 0x1f0   : > { %v1366_v27 = vor.u32 %v1365_v15, %v1316_v46  ;;  %v2800_v52 = vor.u32 %v1319_v17, %v1318_v40 }
 0x1f2   : > { %v1387_v54 = vsel %vm2285_vm3, %v1366_v27, 0  ;;  %v1347_v7 = vsel %vm2480_vm8, 0, %v2800_v52  ;;  %v1340_v52 = vsel %vm2480_vm8, 0, %v2686_v18  ;;  %v943_v18 = vpop.f32.mrf.mxu1 }
 0x1f3   : > { %1423 = vrot.lane.b32.xlu0 %v1381_v23, %s2128_s22  ;;  %1435 = vrot.lane.b32.xlu2 %v1387_v54, %s2128_s22 }
 0x1f4   : > { %1419 = vrot.lane.b32.xlu1 %v1379_v63, %s2128_s22 }
 0x1fb   : > { %1393 = vrot.lane.b32.xlu2 %v2692_v57, %s2127_s19  ;;  %v1342_v57 = vsel %vm2480_vm8, 0, %v2719_v1 }
 0x1fc   : > { %1391 = vrot.lane.b32.xlu1 %v2673_v13, %s2127_s19 }
 0x1fd   : > { %v1426_v62 = vpop.permute.xlu2 %1425 }
 0x203   : > { %1421 = vrot.lane.b32.xlu2 %v1380_v55, %s2128_s22 }
 0x206   : > { %v1398_v1 = vpop.permute.xlu2 %1397 }
 0x207   : > { %v1453_v43 = vsel %vm723_vm9, %v1343_v4, %v1398_v1 }
 0x20e   : > { %v1396_v45 = vpop.permute.xlu1 %1395 }
 0x20f   : > { %v1450_v13 = vsel %vm723_vm9, %v1342_v57, %v1396_v45  ;;  %v1339_v45 = vsel %vm2480_vm8, 0, %v2664_v53 }
 0x210   : > { %v2831_v35 = vsel %vm760_vm10, %v1450_v13, %v1426_v62  ;;  %v944_v13 = vadd.f32 %v943_v18, %v2623_v60 }
 0x211   : > { %1978 = vmatmul.msk.bf16.vlgmr.msra.gmra.mxu3 %vm795_vm11, %v2831_v35 }
 0x216   : > { %v722_v16 = vpop.permute.xlu1 %721 }
 0x217   : > { %v784_v12 = vsel %vm760_vm10, %v759_v50, %v722_v16  ;;  %v1118_v16 = vadd.s32 9, %v2643_v2 }
 0x218   : > { %1968 = vmatmul.msk.bf16.gmra.mxu2 %vm795_vm11, %v784_v12  ;;  %v945_v12 = vpop.f32.mrf.mxu1 }
 0x219   : > { %v946_v4 = vadd.f32 %v945_v12, %v2627_v28  ;;  %vm1128_vm5 = vcmp.ge.s32.totalorder %v1118_v16, 0  ;;  %vm1138_vm12 = vcmp.lt.s32.totalorder %v1118_v16, 16 }
 0x21a   : > { %vm1148_vm13 = vmand %vm1128_vm5, %vm1138_vm12 }
 0x21d   : > { %v1430_v56 = vpop.permute.xlu2 %1429 }
 0x225   : > { %v1428_v33 = vpop.permute.xlu0 %1427 }
 0x226   : > { %v2845_v39 = vsel %vm760_vm10, %v1453_v43, %v1428_v33 }
 0x227   : > { %1979 = vmatmul.msk.bf16.gmra.mxu3 %vm795_vm11, %v2845_v39 }
 0x22e   : > { %v1400_v3 = vpop.permute.xlu1 %1399 }
 0x22f   : > { %v1456_v47 = vsel %vm723_vm9, %v1344_v10, %v1400_v3 }
 0x230   : > { %v2854_v37 = vsel %vm760_vm10, %v1456_v47, %v1430_v56 }
 0x236   : > { %v1404_v21 = vpop.permute.xlu2 %1403 }
 0x237   : > { %1980 = vmatmul.msk.bf16.gmra.mxu3 %vm795_vm11, %v2854_v37  ;;  %v1462_v22 = vsel %vm723_vm9, %v1346_v41, %v1404_v21 }
 0x23e   : > { %v1402_v30 = vpop.permute.xlu0 %1401 }
 0x23f   : > { %v1459_v24 = vsel %vm723_vm9, %v1345_v51, %v1402_v30 }
 0x245   : > { %v1432_v36 = vpop.permute.xlu1 %1431 }
 0x246   : > { %v2877_v34 = vsel %vm760_vm10, %v1459_v24, %v1432_v36 }
 0x247   : > { %1981 = vmatmul.msk.bf16.gmra.mxu3 %vm795_vm11, %v2877_v34 }
 0x24d   : > { %v1436_v29 = vpop.permute.xlu2 %1435 }
 0x255   : > { %v1434_v46 = vpop.permute.xlu0 %1433  ;;  %v1394_v15 = vpop.permute.xlu2 %1393 }
 0x256   : > { %v2886_v17 = vsel %vm760_vm10, %v1462_v22, %v1434_v46  ;;  %v1447_v23 = vsel %vm723_vm9, %v1341_v61, %v1394_v15  ;;  %v2990_v61 = vld [vmem:[%s3116_s6] ss:$0 sm:$0xff] }
 0x257   : > { %1982 = vmatmul.msk.bf16.gmra.mxu3 %vm795_vm11, %v2886_v17 }
 0x25d   : > { %v1390_v14 = vpop.permute.xlu0 %1389  ;;  %v1422_v11 = vpop.permute.xlu2 %1421 }
 0x25e   : > { %v1406_v40 = vpop.permute.xlu1 %1405  ;;  %v1441_v57 = vsel %vm723_vm9, %v1339_v45, %v1390_v14 }
 0x25f   : > { %v1465_v27 = vsel %vm723_vm9, %v1347_v7, %v1406_v40 }
 0x260   : > { %v2900_v49 = vsel %vm760_vm10, %v1465_v27, %v1436_v29  ;;  %v2985_v27 = vld [vmem:[%s3115_s5] ss:$0 sm:$0xff] }
 0x265   : > { %v1424_v54 = vpop.permute.xlu0 %1423 }
 0x266   : > { %v1474_v63 = vsel %vm760_vm10, %v1447_v23, %v1424_v54  ;;  %v1420_v32 = vpop.permute.xlu1 %1419  ;;  %v2071_v54 = vld [vmem:[%s2226_s16] sm:$0xf] }
 0x267   : > { %1983 = vmatmul.msk.bf16.gmra.mxu3 %vm795_vm11, %v2900_v49  ;;  %2002 = vmatmul.msk.bf16.vlgmr.msrb.gmra.mxu0 %vm795_vm11, %v1474_v63  ;;  %v1470_v62 = vsel %vm760_vm10, %v1441_v57, %v1420_v32  ;;  %v2072_v57 = vld [vmem:[%s2226_s16 + $0x4] sm:$0xf] }
 0x26e   : > { %v1392_v55 = vpop.permute.xlu1 %1391 }
 0x26f   : > { %v1444_v6 = vsel %vm723_vm9, %v1340_v52, %v1392_v55 }
 0x270   : > { %v1472_v44 = vsel %vm760_vm10, %v1444_v6, %v1422_v11 }
 0x271   : > { %1976 = vmatmul.msk.bf16.vlgmr.msrb.gmra.mxu2 %vm795_vm11, %v1472_v44 }
 0x277   : > { %1988 = vmatmul.msk.bf16.vlgmr.msrb.gmra.mxu3 %vm795_vm11, %v1470_v62  ;;  %2003 = vmatmul.msk.bf16.gmra.mxu0 %vm795_vm11, %v2831_v35  ;;  %v1705_v62 = vunpack.c.l.bf16 %v2072_v57 }
 0x281   : > { %1977 = vmatmul.msk.bf16.gmra.mxu2 %vm795_vm11, %v1474_v63 }
 0x287   : > { %1989 = vmatmul.msk.bf16.gmra.mxu3 %vm795_vm11, %v1472_v44  ;;  %2004 = vmatmul.msk.bf16.gmra.mxu0 %vm795_vm11, %v2845_v39 }
 0x294   : > { %v2926_v53 = vpop.f32.mrf.mxu3 }
 0x297   : > { %1990 = vmatmul.msk.bf16.gmra.mxu3 %vm795_vm11, %v1474_v63  ;;  %2005 = vmatmul.msk.bf16.gmra.mxu0 %vm795_vm11, %v2854_v37  ;;  %v1704_v63 = vunpack.c.l.bf16 %v2071_v54 }
 0x29b   : > { %v1015_v31 = vpop.f32.mrf.mxu2 }
 0x29c   : > { %v1038_v25 = vadd.f32 %v1015_v31, %v944_v13  ;;  %v2933_v43 = vpop.f32.mrf.mxu3 }
 0x29e   : > { %v1062_v50 = vmul.f32 %v2632_v5, %v1038_v25 }
 0x2a0   : > { %v1086_v1 = vadd.f32 %v2637_v8, %v1062_v50 }
 0x2a2   : > { %v1106_v3 = vmax.f32 %v1086_v1, 0.0 }
 0x2a3   : > { %v1017_v33 = vpop.f32.mrf.mxu2 }
 0x2a4   : > { %v1039_v10 = vadd.f32 %v1017_v33, %v946_v4  ;;  %v1187_v47 = vsel %vm1148_vm13, %v1106_v3, 0.0  ;;  %v2073_v33 = vld [vmem:[%s2226_s16 + $0x8] sm:$0xf] }
 0x2a5   : > { %v1207_v48 = vpack.c.bf16 %v1187_v47, %v1187_v47  ;;  %v1706_v3 = vunpack.c.l.bf16 %v2073_v33 }
 0x2a6   : > { %v1063_v60 = vmul.f32 %v2632_v5, %v1039_v10 }
 0x2a7   : > { %1991 = vmatmul.msk.bf16.gmra.mxu3 %vm795_vm11, %v2831_v35  ;;  %2006 = vmatmul.msk.bf16.gmra.mxu0 %vm795_vm11, %v2877_v34  ;;  %v1247_v38 = vunpack.c.l.b16 %v1207_v48 }
 0x2a8   : > { %v1087_v2 = vadd.f32 %v2637_v8, %v1063_v60 }
 0x2aa   : > { %v1107_v28 = vmax.f32 %v1087_v2, 0.0  ;;  %v2941_v56 = vpop.f32.mrf.mxu3 }
 0x2ac   : > { %v1188_v0 = vsel %vm1148_vm13, %v1107_v28, 0.0 }
 0x2ad   : > { %v1208_v9 = vpack.c.bf16 %v1188_v0, %v1188_v0 }
 0x2af   : > { %v1248_v59 = vunpack.c.l.b16 %v1208_v9 }
 0x2b1   : > { %v1258_v58 = vpack.c.b16 %v1248_v59, %v1247_v38  ;;  %v2074_v59 = vld [vmem:[%s2226_s16 + $0xc] sm:$0xf] }
 0x2b2   : > { %v2943_v19 = vpop.f32.mrf.mxu3 }
 0x2b3   : > { %1407 = vrot.lane.b32.xlu0 %v1258_v58, %s2127_s19  ;;  %v1323_v5 = vshrl.u32 %v1258_v58, 16  ;;  %v1326_v35 = vshll.u32 %v1258_v58, 16  ;;  %s1913_s19 = sshll.u32 %s3143_s25, 5  ;;  %v1707_v58 = vunpack.c.l.bf16 %v2074_v59 }
 0x2b5   : > { %v1325_v26 = vrot.slane %v1323_v5, 7  ;;  %v1367_v30 = vrot.slane %v1326_v35, 1 }
 0x2b7   : > { %1992 = vmatmul.msk.bf16.gmra.mxu3 %vm795_vm11, %v2845_v39  ;;  %2007 = vmatmul.msk.bf16.gmra.mxu0 %vm795_vm11, %v2886_v17  ;;  %v1368_v8 = vor.u32 %v1367_v30, %v1323_v5  ;;  %v2950_v51 = vor.u32 %v1326_v35, %v1325_v26 }
 0x2b9   : > { %v1388_v24 = vsel %vm2285_vm3, %v1368_v8, 0 }
 0x2ba   : > { %1437 = vrot.lane.b32.xlu1 %v1388_v24, %s2128_s22  ;;  %v2955_v36 = vpop.f32.mrf.mxu3  ;;  %s1912_s22 = sshll.u32 %s3149_s8, 1 }
 0x2bb   : > { %s300_s14 = sadd.s32 %s1913_s19, %s1912_s22 }
 0x2bc   : > { %s1914_s25 = sshll.u32 %s300_s14, 3 }
 0x2bd   : > { %s2998_s17 = scalar_lea.vmem %s3117_s7, %s1914_s25 }
 0x2c2   : > { %v2957_v21 = vpop.f32.mrf.mxu3 }
 0x2c7   : > { %1993 = vmatmul.msk.bf16.gmra.mxu3 %vm795_vm11, %v2854_v37  ;;  %2008 = vmatmul.msk.bf16.gmra.mxu0 %vm795_vm11, %v2900_v49 }
 0x2ca   : > { %v2963_v39 = vpop.f32.mrf.mxu3 }
 0x2d2   : > { %v2965_v41 = vpop.f32.mrf.mxu3 }
 0x2d7   : > { %1994 = vmatmul.msk.bf16.gmra.mxu3 %vm795_vm11, %v2877_v34 }
 0x2da   : > { %v2969_v42 = vpop.f32.mrf.mxu3 }
 0x2e2   : > { %v2971_v22 = vpop.f32.mrf.mxu3 }
 0x2e4   : > { %v1648_v46 = vpop.f32.mrf.mxu0 }
 0x2e7   : > { %1995 = vmatmul.msk.bf16.gmra.mxu3 %vm795_vm11, %v2886_v17 }
 0x2ea   : > { %v2975_v37 = vpop.f32.mrf.mxu3 }
 0x2ec   : > { %v1650_v29 = vpop.f32.mrf.mxu0 }
 0x2f2   : > { %v2977_v14 = vpop.f32.mrf.mxu3 }
 0x2f4   : > { %v1527_v40 = vpop.f32.mrf.mxu2  ;;  %v1653_v15 = vpop.f32.mrf.mxu0 }
 0x2fa   : > { %v1586_v7 = vpop.f32.mrf.mxu3 }
 0x2fb   : > { %v1587_v34 = vadd.f32 %v1586_v7, %v1527_v40  ;;  %v2075_v40 = vld [vmem:[%s2226_s16 + $0x10] sm:$0xf] }
 0x2fc   : > { %v1529_v23 = vpop.f32.mrf.mxu2  ;;  %v1655_v49 = vpop.f32.mrf.mxu0 }
 0x2fd   : > { %v1688_v17 = vadd.f32 %v1648_v46, %v1587_v34 }
 0x2ff   : > { %v1724_v32 = vmul.f32 %v2985_v27, %v1688_v17 }
 0x301   : > { %v1744_v52 = vadd.f32 %v2990_v61, %v1724_v32 }
 0x302   : > { %v1588_v55 = vpop.f32.mrf.mxu3 }
 0x303   : > { %v1760_v11 = vadd.f32 %v1744_v52, %v1704_v63  ;;  %v1589_v6 = vadd.f32 %v1588_v55, %v1529_v23 }
 0x304   : > { %v1532_v13 = vpop.f32.mrf.mxu2  ;;  %v1658_v25 = vpop.f32.mrf.mxu0 }
 0x305   : > { %v1776_v44 = vmax.f32 %v1760_v11, 0.0  ;;  %v1689_v45 = vadd.f32 %v1650_v29, %v1589_v6 }
 0x307   : > { %1792 = vst.msk [vmem:[%s2998_s17] sm:$0xff] %vm723_vm9, %v1776_v44  ;;  %v1725_v18 = vmul.f32 %v2985_v27, %v1689_v45 }
 0x309   : > { %v1745_v31 = vadd.f32 %v2990_v61, %v1725_v18 }
 0x30a   : > { %v1591_v50 = vpop.f32.mrf.mxu3 }
 0x30b   : > { %v1761_v16 = vadd.f32 %v1745_v31, %v1705_v62  ;;  %v1592_v12 = vadd.f32 %v1591_v50, %v1532_v13  ;;  %v2077_v50 = vld [vmem:[%s2226_s16 + $0x18] sm:$0xf] }
 0x30c   : > { %v1534_v2 = vpop.f32.mrf.mxu2  ;;  %v1660_v0 = vpop.f32.mrf.mxu0 }
 0x30d   : > { %v1777_v1 = vmax.f32 %v1761_v16, 0.0  ;;  %v1690_v4 = vadd.f32 %v1653_v15, %v1592_v12  ;;  %v1708_v15 = vunpack.c.l.bf16 %v2075_v40  ;;  %v1710_v16 = vunpack.c.l.bf16 %v2077_v50 }
 0x30f   : > { %1793 = vst.msk [vmem:[%s2998_s17 + $0x8] sm:$0xff] %vm723_vm9, %v1777_v1  ;;  %v1726_v10 = vmul.f32 %v2985_v27, %v1690_v4 }
 0x311   : > { %v1746_v60 = vadd.f32 %v2990_v61, %v1726_v10  ;;  %v2078_v10 = vld [vmem:[%s2226_s16 + $0x1c] sm:$0xf] }
 0x312   : > { %v1593_v47 = vpop.f32.mrf.mxu3 }
 0x313   : > { %v1762_v28 = vadd.f32 %v1746_v60, %v1706_v3  ;;  %v1594_v48 = vadd.f32 %v1593_v47, %v1534_v2  ;;  %v1711_v60 = vunpack.c.l.bf16 %v2078_v10  ;;  %v2084_v10 = vld [vmem:[%s2226_s16 + $0x34] sm:$0xf] }
 0x314   : > { %v1663_v29 = vpop.f32.mrf.mxu0 }
 0x315   : > { %v1778_v9 = vmax.f32 %v1762_v28, 0.0  ;;  %v1691_v38 = vadd.f32 %v1655_v49, %v1594_v48  ;;  %v2076_v49 = vld [vmem:[%s2226_s16 + $0x14] sm:$0xf] }
 0x317   : > { %1794 = vst.msk [vmem:[%s2998_s17 + $0x10] sm:$0xff] %vm723_vm9, %v1778_v9  ;;  %v1727_v5 = vmul.f32 %v2985_v27, %v1691_v38 }
 0x319   : > { %v1747_v35 = vadd.f32 %v2990_v61, %v1727_v5 }
 0x31a   : > { %v1596_v26 = vpop.f32.mrf.mxu3 }
 0x31b   : > { %v1763_v30 = vadd.f32 %v1747_v35, %v1707_v58  ;;  %v1597_v8 = vadd.f32 %v1596_v26, %v2926_v53  ;;  %v1709_v53 = vunpack.c.l.bf16 %v2076_v49 }
 0x31c   : > { %v1665_v55 = vpop.f32.mrf.mxu0 }
 0x31d   : > { %v1779_v24 = vmax.f32 %v1763_v30, 0.0  ;;  %v1692_v46 = vadd.f32 %v1658_v25, %v1597_v8 }
 0x31f   : > { %1795 = vst.msk [vmem:[%s2998_s17 + $0x18] sm:$0xff] %vm723_vm9, %v1779_v24  ;;  %v1728_v7 = vmul.f32 %v2985_v27, %v1692_v46 }
 0x321   : > { %v1748_v34 = vadd.f32 %v2990_v61, %v1728_v7 }
 0x322   : > { %v1598_v17 = vpop.f32.mrf.mxu3 }
 0x323   : > { %v1764_v23 = vadd.f32 %v1748_v34, %v1708_v15  ;;  %v1599_v54 = vadd.f32 %v1598_v17, %v2933_v43  ;;  %v1348_v43 = vsel %vm2480_vm8, 0, %v2950_v51 }
 0x325   : > { %v1780_v63 = vmax.f32 %v1764_v23, 0.0  ;;  %v1693_v32 = vadd.f32 %v1660_v0, %v1599_v54  ;;  %v1408_v6 = vpop.permute.xlu0 %1407 }
 0x326   : > { %v1468_v62 = vsel %vm723_vm9, %v1348_v43, %v1408_v6 }
 0x327   : > { %1796 = vst.msk [vmem:[%s2998_s17 + $0x20] sm:$0xff] %vm723_vm9, %v1780_v63  ;;  %v1729_v52 = vmul.f32 %v2985_v27, %v1693_v32  ;;  %v2081_v63 = vld [vmem:[%s2226_s16 + $0x28] sm:$0xf] }
 0x328   : > { %v1714_v32 = vunpack.c.l.bf16 %v2081_v63 }
 0x329   : > { %v1749_v11 = vadd.f32 %v2990_v61, %v1729_v52 }
 0x32a   : > { %v1601_v44 = vpop.f32.mrf.mxu3 }
 0x32b   : > { %v1765_v45 = vadd.f32 %v1749_v11, %v1709_v53  ;;  %v1602_v57 = vadd.f32 %v1601_v44, %v2941_v56  ;;  %v1668_v56 = vpop.f32.mrf.mxu0 }
 0x32c   : > { %v1438_v18 = vpop.permute.xlu1 %1437 }
 0x32d   : > { %v1781_v13 = vmax.f32 %v1765_v45, 0.0  ;;  %v1694_v31 = vadd.f32 %v1663_v29, %v1602_v57  ;;  %v1488_v25 = vsel %vm760_vm10, %v1468_v62, %v1438_v18  ;;  %v2080_v29 = vld [vmem:[%s2226_s16 + $0x24] sm:$0xf]  ;;  %v2082_v45 = vld [vmem:[%s2226_s16 + $0x2c] sm:$0xf] }
 0x32e   : > { %2009 = vmatmul.msk.bf16.gmra.mxu0 %vm795_vm11, %v1488_v25  ;;  %v1713_v40 = vunpack.c.l.bf16 %v2080_v29  ;;  %v1715_v43 = vunpack.c.l.bf16 %v2082_v45 }
 0x32f   : > { %1797 = vst.msk [vmem:[%s2998_s17 + $0x28] sm:$0xff] %vm723_vm9, %v1781_v13  ;;  %v1730_v20 = vmul.f32 %v2985_v27, %v1694_v31 }
 0x331   : > { %v1750_v51 = vadd.f32 %v2990_v61, %v1730_v20 }
 0x332   : > { %v1603_v12 = vpop.f32.mrf.mxu3 }
 0x333   : > { %v1766_v1 = vadd.f32 %v1750_v51, %v1710_v16  ;;  %v1604_v4 = vadd.f32 %v1603_v12, %v2943_v19  ;;  %v1670_v9 = vpop.f32.mrf.mxu0  ;;  %v2079_v19 = vld [vmem:[%s2226_s16 + $0x20] sm:$0xf]  ;;  %v2083_v16 = vld [vmem:[%s2226_s16 + $0x30] sm:$0xf] }
 0x334   : > { %v1712_v58 = vunpack.c.l.bf16 %v2079_v19  ;;  %v1716_v20 = vunpack.c.l.bf16 %v2083_v16 }
 0x335   : > { %v1782_v33 = vmax.f32 %v1766_v1, 0.0  ;;  %v1695_v3 = vadd.f32 %v1665_v55, %v1604_v4 }
 0x337   : > { %1798 = vst.msk [vmem:[%s2998_s17 + $0x30] sm:$0xff] %vm723_vm9, %v1782_v33  ;;  %v1731_v2 = vmul.f32 %v2985_v27, %v1695_v3 }
 0x339   : > { %v1751_v47 = vadd.f32 %v2990_v61, %v1731_v2 }
 0x33a   : > { %v1606_v28 = vpop.f32.mrf.mxu3 }
 0x33b   : > { %v1767_v48 = vadd.f32 %v1751_v47, %v1711_v60  ;;  %v1607_v0 = vadd.f32 %v1606_v28, %v2955_v36  ;;  %v1673_v46 = vpop.f32.mrf.mxu0  ;;  %v1717_v60 = vunpack.c.l.bf16 %v2084_v10 }
 0x33d   : > { %v1783_v38 = vmax.f32 %v1767_v48, 0.0  ;;  %v1696_v59 = vadd.f32 %v1668_v56, %v1607_v0 }
 0x33f   : > { %1799 = vst.msk [vmem:[%s2998_s17 + $0x38] sm:$0xff] %vm723_vm9, %v1783_v38  ;;  %v1732_v5 = vmul.f32 %v2985_v27, %v1696_v59  ;;  %v2085_v59 = vld [vmem:[%s2226_s16 + $0x38] sm:$0xf] }
 0x340   : > { %v1718_v19 = vunpack.c.l.bf16 %v2085_v59 }
 0x341   : > { %v1752_v35 = vadd.f32 %v2990_v61, %v1732_v5 }
 0x342   : > { %v1608_v26 = vpop.f32.mrf.mxu3 }
 0x343   : > { %v1768_v30 = vadd.f32 %v1752_v35, %v1712_v58  ;;  %v1609_v8 = vadd.f32 %v1608_v26, %v2957_v21  ;;  %v1675_v53 = vpop.f32.mrf.mxu0 }
 0x345   : > { %v1784_v24 = vmax.f32 %v1768_v30, 0.0  ;;  %v1697_v36 = vadd.f32 %v1670_v9, %v1609_v8 }
 0x347   : > { %1800 = vst.msk [vmem:[%s2998_s17 + $0x40] sm:$0xff] %vm723_vm9, %v1784_v24  ;;  %v1733_v15 = vmul.f32 %v2985_v27, %v1697_v36 }
 0x349   : > { %v1753_v7 = vadd.f32 %v2990_v61, %v1733_v15 }
 0x34a   : > { %v1611_v34 = vpop.f32.mrf.mxu3 }
 0x34b   : > { %v1769_v17 = vadd.f32 %v1753_v7, %v1713_v40  ;;  %v1612_v23 = vadd.f32 %v1611_v34, %v2963_v39  ;;  %v1678_v18 = vpop.f32.mrf.mxu0 }
 0x34d   : > { %v1785_v54 = vmax.f32 %v1769_v17, 0.0  ;;  %v1698_v21 = vadd.f32 %v1673_v46, %v1612_v23  ;;  %v2086_v46 = vld [vmem:[%s2226_s16 + $0x3c] sm:$0xf] }
 0x34e   : > { %v1719_v29 = vunpack.c.l.bf16 %v2086_v46 }
 0x34f   : > { %1801 = vst.msk [vmem:[%s2998_s17 + $0x48] sm:$0xff] %vm723_vm9, %v1785_v54  ;;  %v1734_v49 = vmul.f32 %v2985_v27, %v1698_v21 }
 0x351   : > { %v1754_v52 = vadd.f32 %v2990_v61, %v1734_v49 }
 0x352   : > { %v1613_v55 = vpop.f32.mrf.mxu3 }
 0x353   : > { %v1770_v11 = vadd.f32 %v1754_v52, %v1714_v32  ;;  %v1614_v6 = vadd.f32 %v1613_v55, %v2965_v41  ;;  %v1680_v33 = vpop.f32.mrf.mxu0 }
 0x355   : > { %v1786_v44 = vmax.f32 %v1770_v11, 0.0  ;;  %v1699_v39 = vadd.f32 %v1675_v53, %v1614_v6 }
 0x357   : > { %1802 = vst.msk [vmem:[%s2998_s17 + $0x50] sm:$0xff] %vm723_vm9, %v1786_v44  ;;  %v1735_v57 = vmul.f32 %v2985_v27, %v1699_v39 }
 0x359   : > { %v1755_v62 = vadd.f32 %v2990_v61, %v1735_v57 }
 0x35a   : > { %v1616_v13 = vpop.f32.mrf.mxu3 }
 0x35b   : > { %v1771_v31 = vadd.f32 %v1755_v62, %v1715_v43  ;;  %v1617_v25 = vadd.f32 %v1616_v13, %v2969_v42 }
 0x35d   : > { %v1787_v50 = vmax.f32 %v1771_v31, 0.0  ;;  %v1700_v41 = vadd.f32 %v1678_v18, %v1617_v25 }
 0x35f   : > { %1803 = vst.msk [vmem:[%s2998_s17 + $0x58] sm:$0xff] %vm723_vm9, %v1787_v50  ;;  %v1736_v51 = vmul.f32 %v2985_v27, %v1700_v41 }
 0x361   : > { %v1756_v56 = vadd.f32 %v2990_v61, %v1736_v51 }
 0x362   : > { %v1618_v12 = vpop.f32.mrf.mxu3 }
 0x363   : > { %v1772_v1 = vadd.f32 %v1756_v56, %v1716_v20  ;;  %v1619_v4 = vadd.f32 %v1618_v12, %v2971_v22 }
 0x365   : > { %v1788_v3 = vmax.f32 %v1772_v1, 0.0  ;;  %v1701_v42 = vadd.f32 %v1680_v33, %v1619_v4 }
 0x367   : > { %1804 = vst.msk [vmem:[%s2998_s17 + $0x60] sm:$0xff] %vm723_vm9, %v1788_v3  ;;  %v1737_v2 = vmul.f32 %v2985_v27, %v1701_v42 }
 0x369   : > { %v1757_v47 = vadd.f32 %v2990_v61, %v1737_v2 }
 0x36a   : > { %v1621_v0 = vpop.f32.mrf.mxu3 }
 0x36b   : > { %v1773_v28 = vadd.f32 %v1757_v47, %v1717_v60  ;;  %v1622_v22 = vadd.f32 %v1621_v0, %v2975_v37 }
 0x36d   : > { %v1789_v48 = vmax.f32 %v1773_v28, 0.0 }
 0x36f   : > { %1805 = vst.msk [vmem:[%s2998_s17 + $0x68] sm:$0xff] %vm723_vm9, %v1789_v48 }
 0x372   : > { %v1623_v5 = vpop.f32.mrf.mxu3 }
 0x373   : > { %v1624_v26 = vadd.f32 %v1623_v5, %v2977_v14 }
 0x3ab   : > { %v1683_v9 = vpop.f32.mrf.mxu0 }
 0x3ac   : > { %v1702_v38 = vadd.f32 %v1683_v9, %v1622_v22 }
 0x3ae   : > { %v1738_v58 = vmul.f32 %v2985_v27, %v1702_v38 }
 0x3b0   : > { %v1758_v35 = vadd.f32 %v2990_v61, %v1738_v58 }
 0x3b2   : > { %v1774_v30 = vadd.f32 %v1758_v35, %v1718_v19 }
 0x3b3   : > { %v1685_v8 = vpop.f32.mrf.mxu0 }
 0x3b4   : > { %v1790_v24 = vmax.f32 %v1774_v30, 0.0  ;;  %v1703_v36 = vadd.f32 %v1685_v8, %v1624_v26 }
 0x3b6   : > { %1806 = vst.msk [vmem:[%s2998_s17 + $0x70] sm:$0xff] %vm723_vm9, %v1790_v24  ;;  %v1739_v37 = vmul.f32 %v2985_v27, %v1703_v36 }
 0x3b8   : > { %v1759_v40 = vadd.f32 %v2990_v61, %v1739_v37 }
 0x3ba   : > { %v1775_v15 = vadd.f32 %v1759_v40, %v1719_v29 }
 0x3bc   : > { %v1791_v7 = vmax.f32 %v1775_v15, 0.0 }
 0x3be   : > { %1807 = vst.msk [vmem:[%s2998_s17 + $0x78] sm:$0xff] %vm723_vm9, %v1791_v7 }
 0x3bf PF: > { %s17_s28 = sadd.s32 1, %s2125_s28   ;;  %s3132_s24 = smov %s2117_s26 }
 0x3c0   : > { %p14_p9 = scmp.ge.s32.totalorder %s17_s28, 6   ;;  %s3133_s25 = smov %s2121_s27 }
 0x3c1   : > { %s3134_s26 = smov %s3137_s29  ;;  %s3135_s27 = smov %s3141_s30 }
 0x3c2   :  { %16 = sbr.rel (!%p14_p9) target bundleno = 3 (0x3), region = 85 }

</bundles_post_ra>
